<compile_context>
chip_gen: v7x
topology: tpu7x:2x2x1
jax: 0.10.0
libtpu: 0.0.40
codegen_flags: <defaults>
</compile_context>

<pallas_src>
import numpy as np
import jax
import jax.numpy as jnp
from jax.experimental import pallas as pl
from jax.experimental.pallas import tpu as pltpu

_LANE_PAD = 128          # per-tap lane padding of the conv2 weights / output


# ----------------------------------------------------------------------------
# Fused per-sample kernel: FC+ReLU -> ConvT1+ReLU -> ConvT2 (+resize, +bias).
# ----------------------------------------------------------------------------
def _decoder_kernel(z_ref, wfc_ref, bfc_ref, wc1_ref, b1_ref, wc2_ref,
                    rhb_ref, b2_ref, o_ref, x1_ref):
    f32, bf16 = jnp.float32, jnp.bfloat16
    H, lane_blk = x1_ref.shape                     # (h2, W*C1)
    M1 = b1_ref.shape[1]                           # 2*W*C2
    PAD = wc2_ref.shape[1] // 4                    # 128

    # ---- fc + ReLU (the PyTorch `deconv` Sequential starts with ReLU) -------
    x0 = jnp.dot(z_ref[...].astype(bf16), wfc_ref[...], preferred_element_type=f32)
    x0 = jnp.maximum(x0 + bfc_ref[...], 0.0)       # (1, H*W*C1), lanes = (j, c)

    # ---- regroup to rows = spatial row i via sublane stores (no concat) -----
    for i in range(H):
        x1_ref[i:i + 1, :] = x0[:, i * lane_blk:(i + 1) * lane_blk]

    # ---- ConvT1(64->32, k4, s2, p1): ONE lane-concatenated tap matmul -------
    T = jnp.dot(x1_ref[...].astype(bf16), wc1_ref[...], preferred_element_type=f32)
    t0, t1 = T[:, 0:M1], T[:, M1:2 * M1]
    t2, t3 = T[:, 2 * M1:3 * M1], T[:, 3 * M1:4 * M1]
    # Row scatter (out_row = 2*i + ky - 1) done with VPU shift-adds; rows kept
    # in even-rows-then-odd-rows order (compensated in the rhb packing).
    zrow = jnp.zeros((1, M1), f32)
    even = t1 + jnp.concatenate([zrow, t3[:H - 1, :]], axis=0)   # rows 0,2,...
    odd = t2 + jnp.concatenate([t0[1:, :], zrow], axis=0)        # rows 1,3,...
    y1p = jnp.concatenate([even, odd], axis=0)                   # (2H, 2W*C2)
    y1p = jnp.maximum(y1p + b1_ref[...], 0.0).astype(bf16)

    # ---- ConvT2(32->1) taps + folded column bilinear-resize: one matmul -----
    V = jnp.dot(y1p, wc2_ref[...], preferred_element_type=f32)   # (2H, 4*PAD)
    vstack = jnp.concatenate([V[:, k * PAD:(k + 1) * PAD] for k in range(4)],
                             axis=0)                             # (4*2H, PAD)

    # ---- row scatter + row bilinear-resize + bias: one small matmul ---------
    out = jnp.dot(rhb_ref[...], vstack.astype(bf16), preferred_element_type=f32)
    o_ref[...] = out + b2_ref[...]                               # (nq, PAD)


@jax.jit
def _decoder_forward(z, wfc, bfc, wc1cat, b1row, wc2rcat, rhbrow, b2):
    B, L = z.shape
    nq = rhbrow.shape[0]
    wc1_rows = wc1cat.shape[0]                     # W*C1
    H = wfc.shape[1] // wc1_rows                   # h2
    z3 = z.reshape(B, 1, L)

    out = pl.pallas_call(
        _decoder_kernel,
        out_shape=jax.ShapeDtypeStruct((B, nq, _LANE_PAD), jnp.float32),
        grid=(B,),
        in_specs=[
            pl.BlockSpec((None, 1, L), lambda b: (b, 0, 0)),      # z (per-sample)
            pl.BlockSpec(wfc.shape, lambda b: (0, 0)),            # resident weights
            pl.BlockSpec(bfc.shape, lambda b: (0, 0)),
            pl.BlockSpec(wc1cat.shape, lambda b: (0, 0)),
            pl.BlockSpec(b1row.shape, lambda b: (0, 0)),
            pl.BlockSpec(wc2rcat.shape, lambda b: (0, 0)),
            pl.BlockSpec(rhbrow.shape, lambda b: (0, 0)),
            pl.BlockSpec(b2.shape, lambda b: (0, 0)),
        ],
        out_specs=pl.BlockSpec((None, nq, _LANE_PAD), lambda b: (b, 0, 0)),
        scratch_shapes=[pltpu.VMEM((H, wc1_rows), jnp.float32)],
        compiler_params=pltpu.CompilerParams(
            dimension_semantics=("parallel",)),
    )(z3, wfc, bfc, wc1cat, b1row, wc2rcat, rhbrow, b2)
    # lane-padded (B, nq, 128) -> (B, 1, nq, nq)
    return out[:, :, :nq].reshape(B, 1, nq, nq)


# ----------------------------------------------------------------------------
# Host-side packing helpers.
# ----------------------------------------------------------------------------
def _bilinear_matrix(out_size, in_size):
    """Row-stochastic matrix matching F.interpolate(mode='bilinear',
    align_corners=False).  Identity when out_size == in_size."""
    scale = in_size / out_size
    src = (np.arange(out_size, dtype=np.float64) + 0.5) * scale - 0.5
    src = np.maximum(src, 0.0)
    i0 = np.minimum(np.floor(src).astype(np.int64), in_size - 1)
    i1 = np.minimum(i0 + 1, in_size - 1)
    lam = src - i0
    m = np.zeros((out_size, in_size), np.float64)
    m[np.arange(out_size), i0] += 1.0 - lam
    m[np.arange(out_size), i1] += lam
    return m.astype(np.float32)


class PallasDecoder:
    def __init__(self, latent_dim, nq, key):
        self.nq = nq
        h1 = (nq - 1) // 2 + 1            # Conv2d(k=3,s=2,p=1) output size
        h2 = (h1 - 1) // 2 + 1
        self.channels, self.height, self.width = 64, h2, h2
        self.flatten_dim = self.channels * h2 * h2
        ks = jax.random.split(key, 6)
        s = 0.05
        # fc weight stored as (latent_dim, flatten_dim) so y = z @ W + b,
        # columns in the PyTorch NCHW-flatten order (c*H*W + i*W + j).
        self.fc_w = jax.random.normal(ks[0], (latent_dim, self.flatten_dim), jnp.float32) * s
        self.fc_b = jax.random.normal(ks[1], (self.flatten_dim,), jnp.float32) * s
        # ConvTranspose2d weights in PyTorch layout (Cin, Cout, kH, kW)
        self.w1 = jax.random.normal(ks[2], (64, 32, 4, 4), jnp.float32) * s
        self.b1 = jax.random.normal(ks[3], (32,), jnp.float32) * s
        self.w2 = jax.random.normal(ks[4], (32, 1, 4, 4), jnp.float32) * s
        self.b2 = jax.random.normal(ks[5], (1,), jnp.float32) * s
        self._pack_weights()

    def _pack_weights(self):
        H = W = self.height
        C1, C2, K = 64, 32, 4
        nq = self.nq
        D = 4 * H                              # deconv output spatial size
        M1 = 2 * W * C2
        assert nq <= _LANE_PAD

        fc_w, fc_b = np.asarray(self.fc_w), np.asarray(self.fc_b)
        # Permute FC columns: new col (i*W + j)*C1 + c  <-  old col c*H*W + i*W + j.
        old = np.arange(C1 * H * W).reshape(C1, H, W)
        perm = old.transpose(1, 2, 0).reshape(-1)
        self.wfc_p = jnp.asarray(fc_w[:, perm], jnp.bfloat16)
        self.bfc_p = jnp.asarray(fc_b[perm][None, :], jnp.float32)

        # ConvT1 lane matrices, all 4 ky taps concatenated along lanes.
        w1 = np.asarray(self.w1)
        wc1 = np.zeros((K, W * C1, M1), np.float32)
        for ky in range(K):
            for kx in range(K):
                for j in range(W):
                    sc = 2 * j + kx - 1
                    if 0 <= sc < 2 * W:
                        wc1[ky, j * C1:(j + 1) * C1, sc * C2:(sc + 1) * C2] += w1[:, :, ky, kx]
        self.wc1cat = jnp.asarray(np.concatenate(list(wc1), axis=1), jnp.bfloat16)
        self.b1row = jnp.asarray(np.tile(np.asarray(self.b1), 2 * W)[None, :], jnp.float32)

        # Bilinear resize matrices (identity when nq == D); both row-stochastic.
        rh = _bilinear_matrix(nq, D)
        rw = _bilinear_matrix(nq, D)

        # ConvT2 lane matrices with the column resize folded in; each ky tap is
        # padded to a 128-wide lane block so the final output is lane-dense.
        w2 = np.asarray(self.w2)
        wc2r = np.zeros((K, M1, _LANE_PAD), np.float32)
        for ky in range(K):
            wc2 = np.zeros((M1, D), np.float32)
            for kx in range(K):
                for sc in range(2 * W):
                    t = 2 * sc + kx - 1
                    if 0 <= t < D:
                        wc2[sc * C2:(sc + 1) * C2, t] += w2[:, 0, ky, kx]
            wc2r[ky, :, :nq] = wc2 @ rw.T
        self.wc2rcat = jnp.asarray(np.concatenate(list(wc2r), axis=1), jnp.bfloat16)

        # ConvT2 row scatter + row resize, columns permuted to the kernel's
        # even-rows-then-odd-rows (y1p) order, all 4 ky taps concatenated.
        perm1 = np.concatenate([np.arange(0, 2 * H, 2), np.arange(1, 2 * H, 2)])
        rhb = np.zeros((K, nq, 2 * H), np.float32)
        for ky in range(K):
            for r in range(2 * H):
                a = 2 * r + ky - 1
                if 0 <= a < D:
                    rhb[ky, :, r] = rh[:, a]
        rhbp = rhb[:, :, perm1]
        self.rhbrow = jnp.asarray(np.concatenate(list(rhbp), axis=1), jnp.bfloat16)
        # b2 is added after the resize; exact because rh/rw are row-stochastic.
        self.b2_11 = jnp.asarray(np.asarray(self.b2).reshape(1, 1), jnp.float32)

    def __call__(self, z):
        return _decoder_forward(z, self.wfc_p, self.bfc_p, self.wc1cat, self.b1row,
                                self.wc2rcat, self.rhbrow, self.b2_11)


# ----------------------------------------------------------------------------
# Independent numpy reference (direct ConvTranspose2d scatter formula).
# ----------------------------------------------------------------------------
def _convt_ref(x, w, b):
    # x: (B, Cin, H, W), w: (Cin, Cout, 4, 4), stride=2, padding=1
    B, Cin, H, W = x.shape
    Cout = w.shape[1]
    Hf, Wf = 2 * (H - 1) + 4, 2 * (W - 1) + 4
    y = np.zeros((B, Cout, Hf, Wf), np.float32)
    for ky in range(4):
        for kx in range(4):
            contrib = np.einsum('bihw,io->bohw', x, w[:, :, ky, kx])
            y[:, :, ky:ky + 2 * H:2, kx:kx + 2 * W:2] += contrib
    y = y[:, :, 1:-1, 1:-1]                       # crop output padding=1
    return y + b.reshape(1, Cout, 1, 1)


def _bilinear_ref(x, out_h, out_w):
    B, C, H, W = x.shape

    def idx(out_size, in_size):
        scale = in_size / out_size
        src = (np.arange(out_size, dtype=np.float64) + 0.5) * scale - 0.5
        src = np.maximum(src, 0.0)
        i0 = np.minimum(np.floor(src).astype(np.int64), in_size - 1)
        i1 = np.minimum(i0 + 1, in_size - 1)
        lam = (src - i0).astype(np.float32)
        return i0, i1, lam

    y0, y1, ly = idx(out_h, H)
    x0, x1, lx = idx(out_w, W)
    top = x[:, :, y0, :]
    bot = x[:, :, y1, :]
    top = top[:, :, :, x0] * (1.0 - lx) + top[:, :, :, x1] * lx
    bot = bot[:, :, :, x0] * (1.0 - lx) + bot[:, :, :, x1] * lx
    return top * (1.0 - ly)[None, None, :, None] + bot * ly[None, None, :, None]


def reference_forward(dec, z_np):
    fc_w, fc_b = np.asarray(dec.fc_w), np.asarray(dec.fc_b)
    w1, b1 = np.asarray(dec.w1), np.asarray(dec.b1)
    w2, b2 = np.asarray(dec.w2), np.asarray(dec.b2)
    B = z_np.shape[0]
    x = z_np.astype(np.float32) @ fc_w + fc_b
    x = x.reshape(B, dec.channels, dec.height, dec.width)
    x = np.maximum(x, 0.0)
    x = _convt_ref(x, w1, b1)
    x = np.maximum(x, 0.0)
    x = _convt_ref(x, w2, b2)
    if x.shape[-1] != dec.nq:
        x = _bilinear_ref(x, dec.nq, dec.nq)
    return x.astype(np.float32)


if __name__ == "__main__":
    latent_dim, batch = 32, 2
    key = jax.random.PRNGKey(0)
    kz, kw16, kw14 = jax.random.split(key, 3)
    z = jax.random.normal(kz, (batch, latent_dim), jnp.float32)

    # Tolerances reflect bf16-operand MXU precision (weights stored in bf16).
    # Case 1: nq = 16 -> deconv output already 16x16, resize matrices = identity.
    dec16 = PallasDecoder(latent_dim, nq=16, key=kw16)
    out16 = jax.block_until_ready(dec16(z))
    assert out16.shape == (batch, 1, 16, 16)
    np.testing.assert_allclose(np.asarray(out16), reference_forward(dec16, np.asarray(z)),
                               rtol=2e-2, atol=2e-2)

    # Case 2: nq = 14 -> deconv output 16x16, exercises the fused bilinear resize.
    dec14 = PallasDecoder(latent_dim, nq=14, key=kw14)
    out14 = jax.block_until_ready(dec14(z))
    assert out14.shape == (batch, 1, 14, 14)
    np.testing.assert_allclose(np.asarray(out14), reference_forward(dec14, np.asarray(z)),
                               rtol=2e-2, atol=2e-2)

    print("KERNEL_OK")
</pallas_src>

<mosaic_0001>
module attributes {stable_mosaic.version = 11 : i64} {
  func.func @_decoder_kernel(%arg0: i32, %arg1: memref<1x1x32xf32, #tpu.memory_space<vmem>>, %arg2: memref<32x1024xbf16, #tpu.memory_space<vmem>>, %arg3: memref<1x1024xf32, #tpu.memory_space<vmem>>, %arg4: memref<256x1024xbf16, #tpu.memory_space<vmem>>, %arg5: memref<1x256xf32, #tpu.memory_space<vmem>>, %arg6: memref<256x512xbf16, #tpu.memory_space<vmem>>, %arg7: memref<16x32xbf16, #tpu.memory_space<vmem>>, %arg8: memref<1x1xf32, #tpu.memory_space<vmem>>, %arg9: memref<1x16x128xf32, #tpu.memory_space<vmem>>, %arg10: memref<4x256xf32, #tpu.memory_space<vmem>>) attributes {dimension_semantics = [#tpu.dimension_semantics<parallel>], iteration_bounds = array<i64: 2>, scalar_prefetch = 0 : i64, scratch_operands = 1 : i64, tpu.core_type = #tpu.core_type<tc>, window_params = [{transform_indices = @transform_0, window_bounds = array<i64: 1, 1, 32>}, {pipeline_mode = #tpu.pipeline_mode<synchronous>, transform_indices = @transform_1, window_bounds = array<i64: 32, 1024>}, {pipeline_mode = #tpu.pipeline_mode<synchronous>, transform_indices = @transform_2, window_bounds = array<i64: 1, 1024>}, {pipeline_mode = #tpu.pipeline_mode<synchronous>, transform_indices = @transform_3, window_bounds = array<i64: 256, 1024>}, {pipeline_mode = #tpu.pipeline_mode<synchronous>, transform_indices = @transform_4, window_bounds = array<i64: 1, 256>}, {pipeline_mode = #tpu.pipeline_mode<synchronous>, transform_indices = @transform_5, window_bounds = array<i64: 256, 512>}, {pipeline_mode = #tpu.pipeline_mode<synchronous>, transform_indices = @transform_6, window_bounds = array<i64: 16, 32>}, {pipeline_mode = #tpu.pipeline_mode<synchronous>, transform_indices = @transform_7, window_bounds = array<i64: 1, 1>}, {transform_indices = @transform_8, window_bounds = array<i64: 1, 16, 128>}]} {
    %c0 = arith.constant 0 : index
    %c0_0 = arith.constant 0 : index
    %c0_1 = arith.constant 0 : index
    %0 = vector.load %arg1[%c0, %c0_0, %c0_1] : memref<1x1x32xf32, #tpu.memory_space<vmem>>, vector<1x1x32xf32>
    %1 = vector.shape_cast %0 : vector<1x1x32xf32> to vector<1x32xf32>
    %2 = arith.truncf %1 : vector<1x32xf32> to vector<1x32xbf16>
    %c0_2 = arith.constant 0 : index
    %c0_3 = arith.constant 0 : index
    %3 = vector.load %arg2[%c0_2, %c0_3] : memref<32x1024xbf16, #tpu.memory_space<vmem>>, vector<32x1024xbf16>
    %cst = arith.constant dense<0.000000e+00> : vector<1x1024xf32>
    %4 = tpu.matmul %2, %3, %cst {dimension_numbers = #tpu.dot_dimension_numbers<[1], [0], [0], [1], [0, 0, 1, 1], [], []>} : vector<1x32xbf16>, vector<32x1024xbf16>, vector<1x1024xf32> -> vector<1x1024xf32>
    %c0_4 = arith.constant 0 : index
    %c0_5 = arith.constant 0 : index
    %5 = vector.load %arg3[%c0_4, %c0_5] : memref<1x1024xf32, #tpu.memory_space<vmem>>, vector<1x1024xf32>
    %6 = arith.addf %4, %5 : vector<1x1024xf32>
    %cst_6 = arith.constant 0.000000e+00 : f32
    %7 = vector.broadcast %cst_6 : f32 to vector<1x1024xf32>
    %8 = arith.maximumf %6, %7 : vector<1x1024xf32>
    %9 = vector.extract_strided_slice %8 {offsets = [0, 0], sizes = [1, 256], strides = [1, 1]} : vector<1x1024xf32> to vector<1x256xf32>
    %c0_7 = arith.constant 0 : index
    %c0_8 = arith.constant 0 : index
    %10 = vector.load %arg10[%c0_7, %c0_8] : memref<4x256xf32, #tpu.memory_space<vmem>>, vector<1x256xf32>
    tpu.vector_store %arg10[%c0_7, %c0_8], %9 {strides = array<i32>} : memref<4x256xf32, #tpu.memory_space<vmem>>, vector<1x256xf32>,
    %11 = vector.extract_strided_slice %8 {offsets = [0, 256], sizes = [1, 256], strides = [1, 1]} : vector<1x1024xf32> to vector<1x256xf32>
    %c1 = arith.constant 1 : index
    %c0_9 = arith.constant 0 : index
    %12 = vector.load %arg10[%c1, %c0_9] : memref<4x256xf32, #tpu.memory_space<vmem>>, vector<1x256xf32>
    tpu.vector_store %arg10[%c1, %c0_9], %11 {strides = array<i32>} : memref<4x256xf32, #tpu.memory_space<vmem>>, vector<1x256xf32>,
    %13 = vector.extract_strided_slice %8 {offsets = [0, 512], sizes = [1, 256], strides = [1, 1]} : vector<1x1024xf32> to vector<1x256xf32>
    %c2 = arith.constant 2 : index
    %c0_10 = arith.constant 0 : index
    %14 = vector.load %arg10[%c2, %c0_10] : memref<4x256xf32, #tpu.memory_space<vmem>>, vector<1x256xf32>
    tpu.vector_store %arg10[%c2, %c0_10], %13 {strides = array<i32>} : memref<4x256xf32, #tpu.memory_space<vmem>>, vector<1x256xf32>,
    %15 = vector.extract_strided_slice %8 {offsets = [0, 768], sizes = [1, 256], strides = [1, 1]} : vector<1x1024xf32> to vector<1x256xf32>
    %c3 = arith.constant 3 : index
    %c0_11 = arith.constant 0 : index
    %16 = vector.load %arg10[%c3, %c0_11] : memref<4x256xf32, #tpu.memory_space<vmem>>, vector<1x256xf32>
    tpu.vector_store %arg10[%c3, %c0_11], %15 {strides = array<i32>} : memref<4x256xf32, #tpu.memory_space<vmem>>, vector<1x256xf32>,
    %c0_12 = arith.constant 0 : index
    %c0_13 = arith.constant 0 : index
    %17 = vector.load %arg10[%c0_12, %c0_13] : memref<4x256xf32, #tpu.memory_space<vmem>>, vector<4x256xf32>
    %18 = arith.truncf %17 : vector<4x256xf32> to vector<4x256xbf16>
    %c0_14 = arith.constant 0 : index
    %c0_15 = arith.constant 0 : index
    %19 = vector.load %arg4[%c0_14, %c0_15] : memref<256x1024xbf16, #tpu.memory_space<vmem>>, vector<256x1024xbf16>
    %cst_16 = arith.constant dense<0.000000e+00> : vector<4x1024xf32>
    %20 = tpu.matmul %18, %19, %cst_16 {dimension_numbers = #tpu.dot_dimension_numbers<[1], [0], [0], [1], [0, 0, 1, 1], [], []>} : vector<4x256xbf16>, vector<256x1024xbf16>, vector<4x1024xf32> -> vector<4x1024xf32>
    %21 = vector.extract_strided_slice %20 {offsets = [0, 0], sizes = [4, 256], strides = [1, 1]} : vector<4x1024xf32> to vector<4x256xf32>
    %22 = vector.extract_strided_slice %20 {offsets = [0, 256], sizes = [4, 256], strides = [1, 1]} : vector<4x1024xf32> to vector<4x256xf32>
    %23 = vector.extract_strided_slice %20 {offsets = [0, 512], sizes = [4, 256], strides = [1, 1]} : vector<4x1024xf32> to vector<4x256xf32>
    %24 = vector.extract_strided_slice %20 {offsets = [0, 768], sizes = [4, 256], strides = [1, 1]} : vector<4x1024xf32> to vector<4x256xf32>
    %cst_17 = arith.constant 0.000000e+00 : f32
    %25 = vector.broadcast %cst_17 : f32 to vector<1x256xf32>
    %26 = vector.extract_strided_slice %24 {offsets = [0, 0], sizes = [3, 256], strides = [1, 1]} : vector<4x256xf32> to vector<3x256xf32>
    %27 = tpu.concatenate %25, %26 in 0 : vector<1x256xf32>, vector<3x256xf32> -> vector<4x256xf32>
    %28 = arith.addf %22, %27 : vector<4x256xf32>
    %29 = vector.extract_strided_slice %21 {offsets = [1, 0], sizes = [3, 256], strides = [1, 1]} : vector<4x256xf32> to vector<3x256xf32>
    %30 = tpu.concatenate %29, %25 in 0 : vector<3x256xf32>, vector<1x256xf32> -> vector<4x256xf32>
    %31 = arith.addf %23, %30 : vector<4x256xf32>
    %32 = tpu.concatenate %28, %31 in 0 : vector<4x256xf32>, vector<4x256xf32> -> vector<8x256xf32>
    %c0_18 = arith.constant 0 : index
    %c0_19 = arith.constant 0 : index
    %33 = vector.load %arg5[%c0_18, %c0_19] : memref<1x256xf32, #tpu.memory_space<vmem>>, vector<1x256xf32>
    %34 = vector.broadcast %33 : vector<1x256xf32> to vector<8x256xf32>
    %35 = arith.addf %32, %34 : vector<8x256xf32>
    %cst_20 = arith.constant 0.000000e+00 : f32
    %36 = vector.broadcast %cst_20 : f32 to vector<8x256xf32>
    %37 = arith.maximumf %35, %36 : vector<8x256xf32>
    %38 = arith.truncf %37 : vector<8x256xf32> to vector<8x256xbf16>
    %c0_21 = arith.constant 0 : index
    %c0_22 = arith.constant 0 : index
    %39 = vector.load %arg6[%c0_21, %c0_22] : memref<256x512xbf16, #tpu.memory_space<vmem>>, vector<256x512xbf16>
    %cst_23 = arith.constant dense<0.000000e+00> : vector<8x512xf32>
    %40 = tpu.matmul %38, %39, %cst_23 {dimension_numbers = #tpu.dot_dimension_numbers<[1], [0], [0], [1], [0, 0, 1, 1], [], []>} : vector<8x256xbf16>, vector<256x512xbf16>, vector<8x512xf32> -> vector<8x512xf32>
    %41 = vector.extract_strided_slice %40 {offsets = [0, 0], sizes = [8, 128], strides = [1, 1]} : vector<8x512xf32> to vector<8x128xf32>
    %42 = vector.extract_strided_slice %40 {offsets = [0, 128], sizes = [8, 128], strides = [1, 1]} : vector<8x512xf32> to vector<8x128xf32>
    %43 = vector.extract_strided_slice %40 {offsets = [0, 256], sizes = [8, 128], strides = [1, 1]} : vector<8x512xf32> to vector<8x128xf32>
    %44 = vector.extract_strided_slice %40 {offsets = [0, 384], sizes = [8, 128], strides = [1, 1]} : vector<8x512xf32> to vector<8x128xf32>
    %45 = tpu.concatenate %41, %42, %43, %44 in 0 : vector<8x128xf32>, vector<8x128xf32>, vector<8x128xf32>, vector<8x128xf32> -> vector<32x128xf32>
    %c0_24 = arith.constant 0 : index
    %c0_25 = arith.constant 0 : index
    %46 = vector.load %arg7[%c0_24, %c0_25] : memref<16x32xbf16, #tpu.memory_space<vmem>>, vector<16x32xbf16>
    %47 = arith.truncf %45 : vector<32x128xf32> to vector<32x128xbf16>
    %cst_26 = arith.constant dense<0.000000e+00> : vector<16x128xf32>
    %48 = tpu.matmul %46, %47, %cst_26 {dimension_numbers = #tpu.dot_dimension_numbers<[1], [0], [0], [1], [0, 0, 1, 1], [], []>} : vector<16x32xbf16>, vector<32x128xbf16>, vector<16x128xf32> -> vector<16x128xf32>
    %c0_27 = arith.constant 0 : index
    %c0_28 = arith.constant 0 : index
    %49 = vector.load %arg8[%c0_27, %c0_28] : memref<1x1xf32, #tpu.memory_space<vmem>>, vector<1x1xf32>
    %50 = vector.broadcast %49 : vector<1x1xf32> to vector<16x128xf32>
    %51 = arith.addf %48, %50 : vector<16x128xf32>
    %c0_29 = arith.constant 0 : index
    %c0_30 = arith.constant 0 : index
    %c0_31 = arith.constant 0 : index
    %52 = vector.load %arg9[%c0_29, %c0_30, %c0_31] : memref<1x16x128xf32, #tpu.memory_space<vmem>>, vector<1x16x128xf32>
    %53 = vector.shape_cast %52 : vector<1x16x128xf32> to vector<16x128xf32>
    %54 = vector.shape_cast %51 : vector<16x128xf32> to vector<1x16x128xf32>
    tpu.vector_store %arg9[%c0_29, %c0_30, %c0_31], %54 {strides = array<i32>} : memref<1x16x128xf32, #tpu.memory_space<vmem>>, vector<1x16x128xf32>,
    return
  }
  func.func @transform_0(%arg0: i32) -> (i32, i32, i32) {
    %c0_i32 = arith.constant 0 : i32
    %c0_i32_0 = arith.constant 0 : i32
    %c0_i32_1 = arith.constant 0 : i32
    return %arg0, %c0_i32, %c0_i32_0 : i32, i32, i32
  }
  func.func @transform_1(%arg0: i32) -> (i32, i32) {
    %c0_i32 = arith.constant 0 : i32
    %c0_i32_0 = arith.constant 0 : i32
    %c0_i32_1 = arith.constant 0 : i32
    return %c0_i32, %c0_i32_0 : i32, i32
  }
  func.func @transform_2(%arg0: i32) -> (i32, i32) {
    %c0_i32 = arith.constant 0 : i32
    %c0_i32_0 = arith.constant 0 : i32
    %c0_i32_1 = arith.constant 0 : i32
    return %c0_i32, %c0_i32_0 : i32, i32
  }
  func.func @transform_3(%arg0: i32) -> (i32, i32) {
    %c0_i32 = arith.constant 0 : i32
    %c0_i32_0 = arith.constant 0 : i32
    %c0_i32_1 = arith.constant 0 : i32
    return %c0_i32, %c0_i32_0 : i32, i32
  }
  func.func @transform_4(%arg0: i32) -> (i32, i32) {
    %c0_i32 = arith.constant 0 : i32
    %c0_i32_0 = arith.constant 0 : i32
    %c0_i32_1 = arith.constant 0 : i32
    return %c0_i32, %c0_i32_0 : i32, i32
  }
  func.func @transform_5(%arg0: i32) -> (i32, i32) {
    %c0_i32 = arith.constant 0 : i32
    %c0_i32_0 = arith.constant 0 : i32
    %c0_i32_1 = arith.constant 0 : i32
    return %c0_i32, %c0_i32_0 : i32, i32
  }
  func.func @transform_6(%arg0: i32) -> (i32, i32) {
    %c0_i32 = arith.constant 0 : i32
    %c0_i32_0 = arith.constant 0 : i32
    %c0_i32_1 = arith.constant 0 : i32
    return %c0_i32, %c0_i32_0 : i32, i32
  }
  func.func @transform_7(%arg0: i32) -> (i32, i32) {
    %c0_i32 = arith.constant 0 : i32
    %c0_i32_0 = arith.constant 0 : i32
    %c0_i32_1 = arith.constant 0 : i32
    return %c0_i32, %c0_i32_0 : i32, i32
  }
  func.func @transform_8(%arg0: i32) -> (i32, i32, i32) {
    %c0_i32 = arith.constant 0 : i32
    %c0_i32_0 = arith.constant 0 : i32
    %c0_i32_1 = arith.constant 0 : i32
    return %arg0, %c0_i32, %c0_i32_0 : i32, i32, i32
  }
}

</mosaic_0001>

<bundles_post_ra>
// kernel: _decoder_forward.1
= control target key start
LH: loop header
LB: loop body
LE: loop exit
PB: predicated region body
PF: predicated region fallthrough
CT: control target
= control target key end

     0   :  { %s3103_s0 = inlined_call_operand.vmem [shape: f32[2,1,32], index: 0, kind: input, shape index: {}]   ;;  %s3104_s1 = inlined_call_operand.hbm [shape: bf16[32,1024], index: 1, kind: input, shape index: {}]   ;;  %s3105_s2 = inlined_call_operand.vmem [shape: f32[1,1024], index: 2, kind: input, shape index: {}]   ;;  %s3106_s3 = inlined_call_operand.hbm [shape: bf16[256,1024], index: 3, kind: input, shape index: {}]   ;;  %s3107_s4 = inlined_call_operand.vmem [shape: f32[1,256], index: 4, kind: input, shape index: {}]   ;;  %s3108_s5 = inlined_call_operand.hbm [shape: bf16[256,512], index: 5, kind: input, shape index: {}]   ;;  %s3109_s6 = inlined_call_operand.vmem [shape: bf16[16,32], index: 6, kind: input, shape index: {}]   ;;  %s3110_s7 = inlined_call_operand.<no memory space> [shape: f32[1,1], index: 7, kind: input, shape index: {}]   ;;  %s3111_s8 = inlined_call_operand.vmem [shape: f32[2,16,128], index: 8, kind: output, shape index: {}]  }
   0x1   :  { %v13_v0 = vstv %s3110_s7 }
   0x2   :  { %14 = vst [vmem:[#allocation3] sm:$0x1] %v13_v0 }
   0x3   :  { %15 = vsyncpa [#allocation5], 0 }
   0x4   :  { %16 = vsyncpa [#allocation7], 0  ;;  %s2894_s29 = smov 0  }
   0x5 LB: > { %s2900_s30 = sadd.s32 4294967295, %s2833_s29   ;;  %p2349_p0 = scmp.ge.s32.totalorder %s2833_s29, 1  ;;  %s2833_s29 = sphi %s2894_s29, %s22_s29  }
   0x6   : > { %p226_p1 = scmp.lt.s32.totalorder %s2833_s29, 3  ;;  %p2611_p2 = scmp.eq.s32.totalorder %s2900_s30, 0 }
   0x7   : > { %s2835_s9 = smov [#allocation6]   ;;  %s2836_s11 = smov [#allocation4]  }
   0x8   : > { %p2905_p3 = pnand %p2349_p0, %p226_p1  ;;  %s254_s10 = sshll.u32 %s2835_s9, 4  ;;  %s2909_s10 = int_to_ptr.vmem [resolvable:$true] %s254_s10 }
   0x9   : > { %s238_s12 = sshll.u32 %s2836_s11, 4  ;;  %s2837_s14 = smov [#allocation8]   ;;  %s2913_s12 = int_to_ptr.vmem [resolvable:$true] %s238_s12 }
   0xa   : > { %p2601_p4 = pneg %p2905_p3  ;;  %s270_s15 = sshll.u32 %s2837_s14, 4  ;;  %s2921_s15 = int_to_ptr.vmem [resolvable:$true] %s270_s15 }
   0xb   : > { %s2735_s18 = scalar_lea.hbm %s3106_s3, 16384 }
   0xc   : > { %p2917_p5 = pnand %p2611_p2, %p2601_p4  ;;  %p2736_p6 = scmp.ne.s32.totalorder %s3106_s3, %s2735_s18 }
   0xd   : > { %p2742_p10 = scmp.lt.u32.totalorder %s2735_s18, %s3106_s3 }
   0xe   : > { %p2931_p7 = pneg %p2917_p5 }
  0x10   : > { %p2738_p8 = pnand %p2931_p7, %p2736_p6 }
  0x12   : > { %p2739_p9 = pneg %p2738_p8 }
  0x14   : > { %p2744_p11 = pnand %p2742_p10, %p2739_p9 }
  0x16   : > { %2747 = shalt.err (!%p2744_p11)
}
  0x17   : > { %s2748_s24 = scalar_lea.vmem %s2909_s10, 16384  ;;  %p2756_p1 = scmp.lt.s32.totalorder %s2909_s10, %s2909_s10 }
  0x18   : > { %p2749_p12 = scmp.ne.s32.totalorder %s2909_s10, %s2748_s24  ;;  %p2757_p4 = scmp.lt.s32.totalorder %s2748_s24, %s2748_s24 }
  0x1a   : > { %p2751_p13 = pnand %p2749_p12, %p2931_p7  ;;  %p2758_p6 = por %p2757_p4, %p2756_p1 }
  0x1c   : > { %p2752_p0 = pneg %p2751_p13 }
  0x1e   : > { %p2759_p8 = pnand %p2758_p6, %p2752_p0 }
  0x20   : > { %2762 = shalt.err (!%p2759_p8)
}
  0x21   : > { %s2838_s25 = smov 512   ;;  %s2839_s26 = smov 32  }
  0x22   : > { %2607 = dma.hbm_to_vmem [thread:$0]  (!%p2917_p5), %s3106_s3, 16384, %s2909_s10, [#allocation7], %s2838_s25, %s2838_s25, %s2839_s26  }
  0x23   : > { %s2763_s14 = scalar_lea.hbm %s3104_s1, 2048 }
  0x24   : > { %p2764_p9 = scmp.ne.s32.totalorder %s3104_s1, %s2763_s14  ;;  %p2770_p12 = scmp.lt.u32.totalorder %s2763_s14, %s3104_s1 }
  0x26   : > { %p2766_p10 = pnand %p2764_p9, %p2931_p7 }
  0x28   : > { %p2767_p11 = pneg %p2766_p10 }
  0x2a   : > { %p2772_p13 = pnand %p2770_p12, %p2767_p11 }
  0x2c   : > { %2775 = shalt.err (!%p2772_p13)
}
  0x2d   : > { %s2776_s10 = scalar_lea.vmem %s2913_s12, 2048  ;;  %p2784_p6 = scmp.lt.s32.totalorder %s2913_s12, %s2913_s12 }
  0x2e   : > { %p2777_p0 = scmp.ne.s32.totalorder %s2913_s12, %s2776_s10  ;;  %p2785_p8 = scmp.lt.s32.totalorder %s2776_s10, %s2776_s10 }
  0x30   : > { %p2779_p1 = pnand %p2777_p0, %p2931_p7  ;;  %p2786_p9 = por %p2785_p8, %p2784_p6 }
  0x32   : > { %p2780_p4 = pneg %p2779_p1 }
  0x34   : > { %p2787_p10 = pnand %p2786_p9, %p2780_p4 }
  0x36   : > { %2790 = shalt.err (!%p2787_p10)
}
  0x37   : > { %2604 = dma.hbm_to_vmem [thread:$0]  (!%p2917_p5), %s3104_s1, 2048, %s2913_s12, [#allocation5], %s2838_s25, %s2838_s25, %s2839_s26  }
  0x38   : > { %s2791_s27 = scalar_lea.hbm %s3108_s5, 8192 }
  0x39   : > { %p2792_p11 = scmp.ne.s32.totalorder %s3108_s5, %s2791_s27  ;;  %p2798_p0 = scmp.lt.u32.totalorder %s2791_s27, %s3108_s5 }
  0x3b   : > { %p2794_p12 = pnand %p2792_p11, %p2931_p7 }
  0x3d   : > { %p2795_p13 = pneg %p2794_p12 }
  0x3f   : > { %p2800_p1 = pnand %p2798_p0, %p2795_p13 }
  0x41   : > { %2803 = shalt.err (!%p2800_p1)
}
  0x42   : > { %s2804_s12 = scalar_lea.vmem %s2921_s15, 8192  ;;  %p2812_p9 = scmp.lt.s32.totalorder %s2921_s15, %s2921_s15 }
  0x43   : > { %p2805_p4 = scmp.ne.s32.totalorder %s2921_s15, %s2804_s12  ;;  %p2813_p10 = scmp.lt.s32.totalorder %s2804_s12, %s2804_s12 }
  0x45   : > { %p2807_p6 = pnand %p2805_p4, %p2931_p7  ;;  %p2814_p11 = por %p2813_p10, %p2812_p9 }
  0x47   : > { %p2808_p8 = pneg %p2807_p6 }
  0x49   : > { %p2815_p12 = pnand %p2814_p11, %p2808_p8 }
  0x4b   : > { %2818 = shalt.err (!%p2815_p12)
}
  0x4c   : > { %s2840_s25 = smov 256   ;;  %s2841_s26 = smov 16  }
  0x4d   : > { %2610 = dma.hbm_to_vmem [thread:$0]  (!%p2917_p5), %s3108_s5, 8192, %s2921_s15, [#allocation7], %s2840_s25, %s2840_s25, %s2841_s26  }
  0x4e   : > { %298 = sbr.rel (%p2905_p3) target bundleno = 1073 (0x431), region = 52 }
  0x55   : > { %2824 = dma.done.wait (%p2611_p2), [#allocation5], 2048  }
  0x56   : > { %2826 = vsyncadd (%p2611_p2), [#allocation5], 4294965248 }
  0x57   : > { %2828 = dma.done.wait (%p2611_p2), [#allocation7], 24576  }
  0x58   : > { %2830 = vsyncadd (%p2611_p2), [#allocation7], 4294942720  ;;  %p338_p7 = scmp.lt.s32.totalorder %s2900_s30, 1  ;;  %v2842_v1 = vmov 0   ;;  %v349_v2 = vld [vmem:[#allocation4] sm:$0xff]  ;;  %v350_v4 = vld [vmem:[#allocation4 + $0x8] sm:$0xff] }
  0x59   : > { %523 = vmatprep.mubr.bf16.mxu0 %v2842_v1  ;;  %564 = vmatprep.mubr.bf16.mxu1 %v2842_v1  ;;  %v353_v3 = vld [vmem:[#allocation4 + $0x20] sm:$0xff]  ;;  %v354_v6 = vld [vmem:[#allocation4 + $0x28] sm:$0xff]  ;;  %v351_v16 = vld [vmem:[#allocation4 + $0x10] sm:$0xff]  ;;  %vm487_vm0 = vcmask 261120   ;;  %vm1701_vm2 = vcmask 1042432   ;;  %vm1690_vm3 = vcmask 1040384  }
  0x5a   : > { %2636 = vset.pattern.permute.xlu0 %v2842_v1  ;;  %s3118_s30 = smov (!%p338_p7, %s2900_s30), 1  ;;  %v2361_v5 = vcombine.high %v349_v2, %v353_v3  ;;  %v2360_v7 = vcombine.low %v349_v2, %v353_v3  ;;  %v357_v8 = vld [vmem:[#allocation4 + $0x40] sm:$0xff]  ;;  %v2363_v10 = vcombine.high %v350_v4, %v354_v6  ;;  %v2362_v11 = vcombine.low %v350_v4, %v354_v6  ;;  %v358_v13 = vld [vmem:[#allocation4 + $0x48] sm:$0xff]  ;;  %v355_v17 = vld [vmem:[#allocation4 + $0x30] sm:$0xff] }
  0x5b   : > { %v361_v9 = vld [vmem:[#allocation4 + $0x60] sm:$0xff]  ;;  %s340_s15 = scalar_lea.vmem %s3103_s0, %s3118_s30  ;;  %v362_v14 = vld [vmem:[#allocation4 + $0x68] sm:$0xff]  ;;  %v352_v18 = vld [vmem:[#allocation4 + $0x18] sm:$0xff]  ;;  %v2365_v23 = vcombine.high %v351_v16, %v355_v17  ;;  %v2364_v30 = vcombine.low %v351_v16, %v355_v17  ;;  %vm1712_vm4 = vcmask 1043456   ;;  %vm2845_vm5 = vmmov 0   ;;  %s2577_s23 = sshll.u32 %s3118_s30, 4 }
  0x5c   : > { %v2369_v12 = vcombine.high %v357_v8, %v361_v9  ;;  %491 = vmatprep.subr.bf16.mxu0 %v2361_v5  ;;  %v2371_v15 = vcombine.high %v358_v13, %v362_v14  ;;  %532 = vmatprep.subr.bf16.mxu1 %v2363_v10  ;;  %v2368_v19 = vcombine.low %v357_v8, %v361_v9  ;;  %v347_v20 = vld [vmem:[%s340_s15] sm:$0x1]  ;;  %v356_v21 = vld [vmem:[#allocation4 + $0x38] sm:$0xff]  ;;  %v752_v34 = vld [vmem:[#allocation6] sm:$0xff]  ;;  %s345_s28 = scalar_lea.vmem %s3111_s8, %s2577_s23 }
  0x5d   : > { %492 = vmatpush1.bf16.msra.mxu0 %v2360_v7  ;;  %533 = vmatpush1.bf16.msra.mxu1 %v2362_v11  ;;  %v2370_v22 = vcombine.low %v358_v13, %v362_v14  ;;  %v2367_v24 = vcombine.high %v352_v18, %v356_v21  ;;  %v359_v25 = vld [vmem:[#allocation4 + $0x50] sm:$0xff]  ;;  %v348_v27 = vpack.c.bf16 %v347_v20, %v347_v20  ;;  %v360_v28 = vld [vmem:[#allocation4 + $0x58] sm:$0xff]  ;;  %v756_v35 = vld [vmem:[#allocation6 + $0x20] sm:$0xff] }
  0x5e   : > { %493 = vmatprep.subr.bf16.mxu0 %v2369_v12  ;;  %534 = vmatprep.subr.bf16.mxu1 %v2371_v15  ;;  %v363_v26 = vld [vmem:[#allocation4 + $0x70] sm:$0xff]  ;;  %v364_v29 = vld [vmem:[#allocation4 + $0x78] sm:$0xff]  ;;  %v2366_v31 = vcombine.low %v352_v18, %v356_v21  ;;  %v753_v36 = vld [vmem:[#allocation6 + $0x8] sm:$0xff]  ;;  %v2381_v40 = vcombine.high %v752_v34, %v756_v35  ;;  %v2380_v46 = vcombine.low %v752_v34, %v756_v35 }
  0x5f   : > { %v2373_v32 = vcombine.high %v359_v25, %v363_v26  ;;  %v2375_v33 = vcombine.high %v360_v28, %v364_v29  ;;  %v757_v37 = vld [vmem:[#allocation6 + $0x28] sm:$0xff]  ;;  %v2372_v38 = vcombine.low %v359_v25, %v363_v26  ;;  %v2374_v39 = vcombine.low %v360_v28, %v364_v29  ;;  %v760_v42 = vld [vmem:[#allocation6 + $0x40] sm:$0xff] }
  0x60   : > { %v2383_v41 = vcombine.high %v753_v36, %v757_v37  ;;  %v764_v43 = vld [vmem:[#allocation6 + $0x60] sm:$0xff]  ;;  %v761_v44 = vld [vmem:[#allocation6 + $0x48] sm:$0xff]  ;;  %v2382_v49 = vcombine.low %v753_v36, %v757_v37 }
  0x61   : > { %494 = vmatpush1.bf16.msra.mxu0 %v2368_v19  ;;  %535 = vmatpush1.bf16.msra.mxu1 %v2370_v22  ;;  %v765_v45 = vld [vmem:[#allocation6 + $0x68] sm:$0xff]  ;;  %v768_v47 = vld [vmem:[#allocation6 + $0x80] sm:$0xff]  ;;  %v2389_v50 = vcombine.high %v760_v42, %v764_v43  ;;  %v2388_v54 = vcombine.low %v760_v42, %v764_v43 }
  0x62   : > { %573 = vmatprep.subr.bf16.mxu0 %v2365_v23  ;;  %614 = vmatprep.subr.bf16.mxu1 %v2367_v24  ;;  %v772_v48 = vld [vmem:[#allocation6 + $0xa0] sm:$0xff]  ;;  %v769_v51 = vld [vmem:[#allocation6 + $0x88] sm:$0xff]  ;;  %v2391_v53 = vcombine.high %v761_v44, %v765_v45  ;;  %v2390_v57 = vcombine.low %v761_v44, %v765_v45 }
  0x63   : > { %v773_v52 = vld [vmem:[#allocation6 + $0xa8] sm:$0xff]  ;;  %v776_v55 = vld [vmem:[#allocation6 + $0xc0] sm:$0xff]  ;;  %v2397_v58 = vcombine.high %v768_v47, %v772_v48  ;;  %v2396_v62 = vcombine.low %v768_v47, %v772_v48 }
  0x64   : > { %2376 = vmatmul.mubr.msk.bf16.vlgmr.msra.gmra.mrb[0].mxu0 %vm487_vm0, %v348_v27  ;;  %2377 = vmatmul.mubr.msk.bf16.vlgmr.msra.gmra.mrb[0].mxu1 %vm487_vm0, %v348_v27  ;;  %v780_v56 = vld [vmem:[#allocation6 + $0xe0] sm:$0xff]  ;;  %v777_v59 = vld [vmem:[#allocation6 + $0xc8] sm:$0xff]  ;;  %v2399_v61 = vcombine.high %v769_v51, %v773_v52 }
  0x65   : > { %574 = vmatpush1.bf16.msra.mxu0 %v2364_v30  ;;  %615 = vmatpush1.bf16.msra.mxu1 %v2366_v31  ;;  %v781_v60 = vld [vmem:[#allocation6 + $0xe8] sm:$0xff]  ;;  %v784_v63 = vld [vmem:[#allocation6 + $0x100] sm:$0xff]  ;;  %v2405_v2 = vcombine.high %v776_v55, %v780_v56  ;;  %v2404_v6 = vcombine.low %v776_v55, %v780_v56 }
  0x66   : > { %575 = vmatprep.subr.bf16.mxu0 %v2373_v32  ;;  %616 = vmatprep.subr.bf16.mxu1 %v2375_v33  ;;  %v788_v0 = vld [vmem:[#allocation6 + $0x120] sm:$0xff]  ;;  %v785_v3 = vld [vmem:[#allocation6 + $0x108] sm:$0xff]  ;;  %v2407_v5 = vcombine.high %v777_v59, %v781_v60  ;;  %v2406_v9 = vcombine.low %v777_v59, %v781_v60 }
  0x67   : > { %605 = vmatprep.mubr.bf16.mxu0 %v2842_v1  ;;  %646 = vmatprep.mubr.bf16.mxu1 %v2842_v1  ;;  %v2398_v1 = vcombine.low %v769_v51, %v773_v52  ;;  %v789_v4 = vld [vmem:[#allocation6 + $0x128] sm:$0xff]  ;;  %v792_v7 = vld [vmem:[#allocation6 + $0x140] sm:$0xff]  ;;  %v2413_v10 = vcombine.high %v784_v63, %v788_v0  ;;  %v2412_v14 = vcombine.low %v784_v63, %v788_v0 }
  0x68   : > { %v796_v8 = vld [vmem:[#allocation6 + $0x160] sm:$0xff]  ;;  %v793_v11 = vld [vmem:[#allocation6 + $0x148] sm:$0xff]  ;;  %v2415_v13 = vcombine.high %v785_v3, %v789_v4  ;;  %v2414_v17 = vcombine.low %v785_v3, %v789_v4 }
  0x69   : > { %576 = vmatpush1.bf16.msra.mxu0 %v2372_v38  ;;  %617 = vmatpush1.bf16.msra.mxu1 %v2374_v39  ;;  %v797_v12 = vld [vmem:[#allocation6 + $0x168] sm:$0xff]  ;;  %v800_v15 = vld [vmem:[#allocation6 + $0x180] sm:$0xff]  ;;  %v2421_v18 = vcombine.high %v792_v7, %v796_v8  ;;  %v2420_v22 = vcombine.low %v792_v7, %v796_v8 }
  0x6a   : > { %1520 = vmatprep.subr.bf16.mxu0 %v2381_v40  ;;  %1561 = vmatprep.subr.bf16.mxu1 %v2383_v41  ;;  %v804_v16 = vld [vmem:[#allocation6 + $0x1a0] sm:$0xff]  ;;  %v801_v19 = vld [vmem:[#allocation6 + $0x188] sm:$0xff]  ;;  %v2423_v21 = vcombine.high %v793_v11, %v797_v12  ;;  %v2422_v24 = vcombine.low %v793_v11, %v797_v12 }
  0x6b   : > { %v805_v20 = vld [vmem:[#allocation6 + $0x1a8] sm:$0xff]  ;;  %v808_v23 = vld [vmem:[#allocation6 + $0x1c0] sm:$0xff]  ;;  %v2429_v25 = vcombine.high %v800_v15, %v804_v16  ;;  %v2428_v30 = vcombine.low %v800_v15, %v804_v16 }
  0x6c   : > { %2378 = vmatmul.mubr.msk.bf16.vlgmr.msra.gmra.mrb[4].mxu0 %vm487_vm0, %v348_v27  ;;  %2379 = vmatmul.mubr.msk.bf16.vlgmr.msra.gmra.mrb[4].mxu1 %vm487_vm0, %v348_v27  ;;  %v2431_v26 = vcombine.high %v801_v19, %v805_v20  ;;  %v812_v27 = vld [vmem:[#allocation6 + $0x1e0] sm:$0xff]  ;;  %v809_v28 = vld [vmem:[#allocation6 + $0x1c8] sm:$0xff]  ;;  %v2430_v31 = vcombine.low %v801_v19, %v805_v20 }
  0x6d   : > { %1521 = vmatpush1.bf16.msra.mxu0 %v2380_v46  ;;  %1562 = vmatpush1.bf16.msra.mxu1 %v2382_v49  ;;  %v813_v29 = vld [vmem:[#allocation6 + $0x1e8] sm:$0xff]  ;;  %v2437_v32 = vcombine.high %v808_v23, %v812_v27  ;;  %v2436_v34 = vcombine.low %v808_v23, %v812_v27  ;;  %v816_v36 = vld [vmem:[#allocation6 + $0x200] sm:$0xff] }
  0x6e   : > { %1522 = vmatprep.subr.bf16.mxu0 %v2389_v50  ;;  %1563 = vmatprep.subr.bf16.mxu1 %v2391_v53  ;;  %v2439_v33 = vcombine.high %v809_v28, %v813_v29  ;;  %v2438_v35 = vcombine.low %v809_v28, %v813_v29  ;;  %v820_v37 = vld [vmem:[#allocation6 + $0x220] sm:$0xff]  ;;  %v817_v38 = vld [vmem:[#allocation6 + $0x208] sm:$0xff] }
  0x6f   : > { %v2445_v39 = vcombine.high %v816_v36, %v820_v37  ;;  %v821_v40 = vld [vmem:[#allocation6 + $0x228] sm:$0xff]  ;;  %v2444_v41 = vcombine.low %v816_v36, %v820_v37  ;;  %v824_v44 = vld [vmem:[#allocation6 + $0x240] sm:$0xff]  ;;  %v3025_v36 = vld [vmem:[#allocation6 + $0x10] sm:$0xff] }
  0x70   : > { %v2446_v42 = vcombine.low %v817_v38, %v821_v40  ;;  %v2447_v43 = vcombine.high %v817_v38, %v821_v40  ;;  %v828_v45 = vld [vmem:[#allocation6 + $0x260] sm:$0xff]  ;;  %v825_v46 = vld [vmem:[#allocation6 + $0x248] sm:$0xff]  ;;  %v3027_v37 = vld [vmem:[#allocation6 + $0x30] sm:$0xff] }
  0x71   : > { %1523 = vmatpush1.bf16.msra.mxu0 %v2388_v54  ;;  %1564 = vmatpush1.bf16.msra.mxu1 %v2390_v57  ;;  %v2453_v47 = vcombine.high %v824_v44, %v828_v45  ;;  %v829_v48 = vld [vmem:[#allocation6 + $0x268] sm:$0xff]  ;;  %v2452_v49 = vcombine.low %v824_v44, %v828_v45  ;;  %v832_v52 = vld [vmem:[#allocation6 + $0x280] sm:$0xff]  ;;  %v3029_v38 = vld [vmem:[#allocation6 + $0x18] sm:$0xff]  ;;  %v447_v44 = vlaneseq }
  0x72   : > { %1524 = vmatprep.subr.bf16.mxu0 %v2397_v58  ;;  %1565 = vmatprep.subr.bf16.mxu1 %v2399_v61  ;;  %v2454_v50 = vcombine.low %v825_v46, %v829_v48  ;;  %v2455_v51 = vcombine.high %v825_v46, %v829_v48  ;;  %v836_v53 = vld [vmem:[#allocation6 + $0x2a0] sm:$0xff]  ;;  %v833_v54 = vld [vmem:[#allocation6 + $0x288] sm:$0xff]  ;;  %v3033_v40 = vld [vmem:[#allocation6 + $0x38] sm:$0xff] }
  0x73   : > { %v2461_v55 = vcombine.high %v832_v52, %v836_v53  ;;  %v837_v56 = vld [vmem:[#allocation6 + $0x2a8] sm:$0xff]  ;;  %v2460_v57 = vcombine.low %v832_v52, %v836_v53  ;;  %v840_v60 = vld [vmem:[#allocation6 + $0x2c0] sm:$0xff]  ;;  %v3041_v45 = vshrl.u32 %v447_v44, 7  ;;  %vm3059_vm1 = vcmp.lt.s32.totalorder %v447_v44, 256 }
  0x74   : > { %v2462_v58 = vcombine.low %v833_v54, %v837_v56  ;;  %v2463_v59 = vcombine.high %v833_v54, %v837_v56  ;;  %v844_v61 = vld [vmem:[#allocation6 + $0x2e0] sm:$0xff]  ;;  %v845_v0 = vld [vmem:[#allocation6 + $0x2e8] sm:$0xff] }
  0x75   : > { %1525 = vmatpush1.bf16.msra.mxu0 %v2396_v62  ;;  %1566 = vmatpush1.bf16.msra.mxu1 %v2398_v1  ;;  %v841_v62 = vld [vmem:[#allocation6 + $0x2c8] sm:$0xff]  ;;  %v2469_v63 = vcombine.high %v840_v60, %v844_v61  ;;  %v2468_v1 = vcombine.low %v840_v60, %v844_v61  ;;  %v848_v4 = vld [vmem:[#allocation6 + $0x300] sm:$0xff]  ;;  %v449_v46 = vsub.s32 0, %v3041_v45  ;;  %v457_v48 = vsub.s32 2, %v3041_v45 }
  0x76   : > { %1526 = vmatprep.subr.bf16.mxu0 %v2405_v2  ;;  %1567 = vmatprep.subr.bf16.mxu1 %v2407_v5  ;;  %v2470_v2 = vcombine.low %v841_v62, %v845_v0  ;;  %v2471_v3 = vcombine.high %v841_v62, %v845_v0  ;;  %v852_v5 = vld [vmem:[#allocation6 + $0x320] sm:$0xff]  ;;  %v853_v8 = vld [vmem:[#allocation6 + $0x328] sm:$0xff]  ;;  %v465_v62 = vsub.s32 4, %v3041_v45 }
  0x77   : > { %v2477_v7 = vcombine.high %v848_v4, %v852_v5  ;;  %v856_v12 = vld [vmem:[#allocation6 + $0x340] sm:$0xff]  ;;  %v861_v16 = vld [vmem:[#allocation6 + $0x368] sm:$0xff] }
  0x78   : > { %v864_v20 = vld [vmem:[#allocation6 + $0x380] sm:$0xff] }
  0x79   : > { %1527 = vmatpush1.bf16.msra.mxu0 %v2404_v6  ;;  %1568 = vmatpush1.bf16.msra.mxu1 %v2406_v9  ;;  %v849_v6 = vld [vmem:[#allocation6 + $0x308] sm:$0xff]  ;;  %v2476_v9 = vcombine.low %v848_v4, %v852_v5  ;;  %v876_v27 = vld [vmem:[#allocation6 + $0x3e0] sm:$0xff]  ;;  %v469_v4 = vsub.s32 5, %v3041_v45 }
  0x7a   : > { %1528 = vmatprep.subr.bf16.mxu0 %v2413_v10  ;;  %1569 = vmatprep.subr.bf16.mxu1 %v2415_v13  ;;  %v2478_v10 = vcombine.low %v849_v6, %v853_v8  ;;  %v2479_v11 = vcombine.high %v849_v6, %v853_v8  ;;  %v860_v13 = vld [vmem:[#allocation6 + $0x360] sm:$0xff] }
  0x7b   : > { %v2485_v15 = vcombine.high %v856_v12, %v860_v13 }
  0x7d   : > { %1529 = vmatpush1.bf16.msra.mxu0 %v2412_v14  ;;  %1570 = vmatpush1.bf16.msra.mxu1 %v2414_v17  ;;  %v857_v14 = vld [vmem:[#allocation6 + $0x348] sm:$0xff]  ;;  %v2484_v17 = vcombine.low %v856_v12, %v860_v13 }
  0x7e   : > { %1530 = vmatprep.subr.bf16.mxu0 %v2421_v18  ;;  %1571 = vmatprep.subr.bf16.mxu1 %v2423_v21  ;;  %v2486_v18 = vcombine.low %v857_v14, %v861_v16  ;;  %v2487_v19 = vcombine.high %v857_v14, %v861_v16  ;;  %v868_v21 = vld [vmem:[#allocation6 + $0x3a0] sm:$0xff] }
  0x7f   : > { %v2492_v23 = vcombine.low %v864_v20, %v868_v21 }
  0x81   : > { %1531 = vmatpush1.bf16.msra.mxu0 %v2420_v22  ;;  %1572 = vmatpush1.bf16.msra.mxu1 %v2422_v24  ;;  %v865_v22 = vld [vmem:[#allocation6 + $0x388] sm:$0xff]  ;;  %v2493_v24 = vcombine.high %v864_v20, %v868_v21 }
  0x82   : > { %1532 = vmatprep.subr.bf16.mxu0 %v2429_v25  ;;  %1573 = vmatprep.subr.bf16.mxu1 %v2431_v26  ;;  %v869_v25 = vld [vmem:[#allocation6 + $0x3a8] sm:$0xff]  ;;  %v872_v26 = vld [vmem:[#allocation6 + $0x3c0] sm:$0xff] }
  0x83   : > { %v2495_v28 = vcombine.high %v865_v22, %v869_v25  ;;  %v2501_v29 = vcombine.high %v872_v26, %v876_v27 }
  0x85   : > { %1533 = vmatpush1.bf16.msra.mxu0 %v2428_v30  ;;  %1574 = vmatpush1.bf16.msra.mxu1 %v2430_v31  ;;  %v873_v30 = vld [vmem:[#allocation6 + $0x3c8] sm:$0xff] }
  0x86   : > { %1534 = vmatprep.subr.bf16.mxu0 %v2437_v32  ;;  %1575 = vmatprep.subr.bf16.mxu1 %v2439_v33  ;;  %v877_v31 = vld [vmem:[#allocation6 + $0x3e8] sm:$0xff]  ;;  %v2494_v32 = vcombine.low %v865_v22, %v869_v25 }
  0x87   : > { %v2503_v33 = vcombine.high %v873_v30, %v877_v31 }
  0x89   : > { %1535 = vmatpush1.bf16.msra.mxu0 %v2436_v34  ;;  %1576 = vmatpush1.bf16.msra.mxu1 %v2438_v35  ;;  %v2500_v34 = vcombine.low %v872_v26, %v876_v27  ;;  %v2502_v35 = vcombine.low %v873_v30, %v877_v31 }
  0x8a   : > { %1536 = vmatprep.subr.bf16.mxu0 %v2445_v39  ;;  %1577 = vmatprep.subr.bf16.mxu1 %v2447_v43  ;;  %v2385_v39 = vcombine.high %v3025_v36, %v3027_v37  ;;  %v2387_v43 = vcombine.high %v3029_v38, %v3033_v40 }
  0x8d   : > { %1537 = vmatpush1.bf16.msra.mxu0 %v2444_v41  ;;  %1578 = vmatpush1.bf16.msra.mxu1 %v2446_v42  ;;  %v2384_v41 = vcombine.low %v3025_v36, %v3027_v37  ;;  %v2386_v42 = vcombine.low %v3029_v38, %v3033_v40 }
  0x8e   : > { %1538 = vmatprep.subr.bf16.mxu0 %v2453_v47  ;;  %1579 = vmatprep.subr.bf16.mxu1 %v2455_v51  ;;  %v365_v47 = vld [vmem:[%s3105_s2] sm:$0xff]  ;;  %v2843_v51 = vmov 1966171168  }
  0x8f   : > { %v667_v52 = vunpack.c.l.s4 %v2843_v51  ;;  %v450_v53 = vrot.slane %v365_v47, %v449_v46  ;;  %v458_v54 = vrot.slane %v365_v47, %v457_v48 }
  0x91   : > { %1539 = vmatpush1.bf16.msra.mxu0 %v2452_v49  ;;  %1580 = vmatpush1.bf16.msra.mxu1 %v2454_v50  ;;  %v453_v49 = vsub.s32 1, %v3041_v45  ;;  %v461_v50 = vsub.s32 3, %v3041_v45 }
  0x92   : > { %1540 = vmatprep.subr.bf16.mxu0 %v2461_v55  ;;  %1581 = vmatprep.subr.bf16.mxu1 %v2463_v59 }
  0x93   : > { %v454_v55 = vrot.slane %v365_v47, %v453_v49  ;;  %v462_v56 = vrot.slane %v365_v47, %v461_v50 }
  0x95   : > { %1541 = vmatpush1.bf16.msra.mxu0 %v2460_v57  ;;  %1582 = vmatpush1.bf16.msra.mxu1 %v2462_v58  ;;  %v668_v58 = vunpack.c.0.s8 %v667_v52 }
  0x96   : > { %1542 = vmatprep.subr.bf16.mxu0 %v2469_v63  ;;  %1583 = vmatprep.subr.bf16.mxu1 %v2471_v3  ;;  %v473_v3 = vsub.s32 6, %v3041_v45 }
  0x97   : > { %v671_v12 = vsub.s32 %v668_v58, %v3041_v45 }
  0x99   : > { %1543 = vmatpush1.bf16.msra.mxu0 %v2468_v1  ;;  %1584 = vmatpush1.bf16.msra.mxu1 %v2470_v2 }
  0x9a   : > { %1544 = vmatprep.subr.bf16.mxu0 %v2477_v7  ;;  %1585 = vmatprep.subr.bf16.mxu1 %v2479_v11 }
  0x9d   : > { %1545 = vmatpush1.bf16.msra.mxu0 %v2476_v9  ;;  %1586 = vmatpush1.bf16.msra.mxu1 %v2478_v10  ;;  %v477_v9 = vsub.s32 7, %v3041_v45  ;;  %v2572_v45 = vld [vmem:[#allocation3] ss:$0 sm:$0xff] }
  0x9e   : > { %1546 = vmatprep.subr.bf16.mxu0 %v2485_v15  ;;  %1587 = vmatprep.subr.bf16.mxu1 %v2487_v19  ;;  %v466_v15 = vrot.slane %v365_v47, %v465_v62  ;;  %v767_v62 = vld [vmem:[#allocation6 + $0x78] sm:$0xff] }
  0x9f   : > { %v478_v20 = vrot.slane %v365_v47, %v477_v9  ;;  %2210 = vperm.xlu0 %2636, %v2572_v45  }
  0xa1   : > { %1547 = vmatpush1.bf16.msra.mxu0 %v2484_v17  ;;  %1588 = vmatpush1.bf16.msra.mxu1 %v2486_v18  ;;  %v474_v17 = vrot.slane %v365_v47, %v473_v3  ;;  %v470_v18 = vrot.slane %v365_v47, %v469_v4  ;;  %v774_v4 = vld [vmem:[#allocation6 + $0xb0] sm:$0xff] }
  0xa2   : > { %1548 = vmatprep.subr.bf16.mxu0 %v2493_v24  ;;  %1589 = vmatprep.subr.bf16.mxu1 %v2495_v28 }
  0xa5   : > { %1549 = vmatpush1.bf16.msra.mxu0 %v2492_v23  ;;  %1590 = vmatpush1.bf16.msra.mxu1 %v2494_v32  ;;  %v795_v23 = vld [vmem:[#allocation6 + $0x158] sm:$0xff] }
  0xa6   : > { %1550 = vmatprep.subr.bf16.mxu0 %v2501_v29  ;;  %1591 = vmatprep.subr.bf16.mxu1 %v2503_v33 }
  0xa9   : > { %1551 = vmatpush1.bf16.msra.mxu0 %v2500_v34  ;;  %1592 = vmatpush1.bf16.msra.mxu1 %v2502_v35 }
  0xaa   : > { %1602 = vmatprep.subr.bf16.mxu0 %v2385_v39  ;;  %1643 = vmatprep.subr.bf16.mxu1 %v2387_v43 }
 0x137   : > { %v525_v57 = vpop.f32.mrb[0].mxu0  ;;  %v566_v60 = vpop.f32.mrb[0].mxu1 }
 0x138   : > { %v526_v59 = vadd.f32 %v525_v57, %v450_v53  ;;  %v527_v61 = vpop.f32.mrb[1].mxu0  ;;  %v567_v63 = vadd.f32 %v566_v60, %v458_v54  ;;  %v568_v1 = vpop.f32.mrb[1].mxu1  ;;  %v766_v60 = vld [vmem:[#allocation6 + $0x70] sm:$0xff] }
 0x139   : > { %v528_v0 = vadd.f32 %v527_v61, %v454_v55  ;;  %v529_v2 = vpop.f32.mrb[2].mxu0  ;;  %v569_v6 = vadd.f32 %v568_v1, %v462_v56  ;;  %v570_v7 = vpop.f32.mrb[2].mxu1  ;;  %v763_v61 = vld [vmem:[#allocation6 + $0x58] sm:$0xff]  ;;  %v770_v1 = vld [vmem:[#allocation6 + $0x90] sm:$0xff] }
 0x13a   : > { %v655_v5 = vmax.f32 %v526_v59, 0.0  ;;  %v530_v8 = vpop.f32.mrb[3].mxu0  ;;  %v657_v10 = vmax.f32 %v567_v63, 0.0  ;;  %v571_v13 = vpop.f32.mrb[3].mxu1  ;;  %v762_v59 = vld [vmem:[#allocation6 + $0x50] sm:$0xff]  ;;  %v2395_v3 = vcombine.high %v763_v61, %v767_v62  ;;  %v2401_v9 = vcombine.high %v770_v1, %v774_v4 }
 0x13b   : > { %v656_v11 = vmax.f32 %v528_v0, 0.0  ;;  %v658_v14 = vmax.f32 %v569_v6, 0.0  ;;  %v2393_v2 = vcombine.high %v762_v59, %v766_v60  ;;  %v775_v6 = vld [vmem:[#allocation6 + $0xb8] sm:$0xff]  ;;  %v2392_v7 = vcombine.low %v762_v59, %v766_v60 }
 0x13c   : > { %v2394_v8 = vcombine.low %v763_v61, %v767_v62  ;;  %v779_v13 = vld [vmem:[#allocation6 + $0xd8] sm:$0xff]  ;;  %v2400_v36 = vcombine.low %v770_v1, %v774_v4  ;;  %v826_v62 = vld [vmem:[#allocation6 + $0x250] sm:$0xff] }
 0x13d   : > { %v665_v16 = vcombine.low %v655_v5, %v656_v11  ;;  %v688_v19 = vcombine.low %v657_v10, %v658_v14  ;;  %v771_v5 = vld [vmem:[#allocation6 + $0x98] sm:$0xff]  ;;  %v778_v11 = vld [vmem:[#allocation6 + $0xd0] sm:$0xff] }
 0x13e   : > { %v2403_v10 = vcombine.high %v771_v5, %v775_v6  ;;  %v783_v14 = vld [vmem:[#allocation6 + $0xf8] sm:$0xff]  ;;  %v2402_v37 = vcombine.low %v771_v5, %v775_v6 }
 0x13f   : > { %v672_v21 = vrot.slane %v665_v16, %v671_v12  ;;  %v607_v22 = vpop.f32.mrb[4].mxu0  ;;  %v695_v24 = vrot.slane %v688_v19, %v671_v12  ;;  %v648_v26 = vpop.f32.mrb[4].mxu1  ;;  %v2411_v40 = vcombine.high %v779_v13, %v783_v14  ;;  %v791_v16 = vld [vmem:[#allocation6 + $0x138] sm:$0xff] }
 0x140   : > { %v608_v25 = vadd.f32 %v607_v22, %v466_v15  ;;  %v609_v27 = vpop.f32.mrb[5].mxu0  ;;  %v649_v29 = vadd.f32 %v648_v26, %v474_v17  ;;  %v650_v31 = vpop.f32.mrb[5].mxu1  ;;  %v787_v15 = vld [vmem:[#allocation6 + $0x118] sm:$0xff]  ;;  %v798_v22 = vld [vmem:[#allocation6 + $0x170] sm:$0xff] }
 0x141   : > { %v679_v28 = vrot.slane %v672_v21, %v671_v12  ;;  %v610_v30 = vadd.f32 %v609_v27, %v470_v18  ;;  %v611_v32 = vpop.f32.mrb[6].mxu0  ;;  %v702_v33 = vrot.slane %v695_v24, %v671_v12  ;;  %v651_v35 = vadd.f32 %v650_v31, %v478_v20  ;;  %v652_v39 = vpop.f32.mrb[6].mxu1  ;;  %v794_v21 = vld [vmem:[#allocation6 + $0x150] sm:$0xff]  ;;  %v799_v24 = vld [vmem:[#allocation6 + $0x178] sm:$0xff] }
 0x142   : > { %v659_v34 = vmax.f32 %v608_v25, 0.0  ;;  %v612_v43 = vpop.f32.mrb[7].mxu0  ;;  %v661_v44 = vmax.f32 %v649_v29, 0.0  ;;  %v653_v48 = vpop.f32.mrb[7].mxu1  ;;  %v2410_v18 = vcombine.low %v779_v13, %v783_v14  ;;  %v2419_v20 = vcombine.high %v787_v15, %v791_v16  ;;  %v802_v29 = vld [vmem:[#allocation6 + $0x190] sm:$0xff]  ;;  %v803_v31 = vld [vmem:[#allocation6 + $0x198] sm:$0xff] }
 0x143   : > { %685 = vst.msk [vmem:[#allocation2] ss:$4 sm:$0x3] %vm3059_vm1, %v679_v28  ;;  %v660_v47 = vmax.f32 %v610_v30, 0.0  ;;  %v662_v50 = vmax.f32 %v651_v35, 0.0  ;;  %v2418_v26 = vcombine.low %v787_v15, %v791_v16  ;;  %v2425_v27 = vcombine.high %v794_v21, %v798_v22  ;;  %v806_v30 = vld [vmem:[#allocation6 + $0x1b0] sm:$0xff] }
 0x144   : > { %705 = vst.msk [vmem:[#allocation2 + $0x1] ss:$4 sm:$0x3] %vm3059_vm1, %v702_v33  ;;  %v2427_v28 = vcombine.high %v795_v23, %v799_v24  ;;  %v807_v32 = vld [vmem:[#allocation6 + $0x1b8] sm:$0xff]  ;;  %v2424_v33 = vcombine.low %v794_v21, %v798_v22  ;;  %v2433_v35 = vcombine.high %v802_v29, %v806_v30  ;;  %v810_v43 = vld [vmem:[#allocation6 + $0x1d0] sm:$0xff] }
 0x145   : > { %v708_v51 = vcombine.low %v659_v34, %v660_v47  ;;  %v728_v52 = vcombine.low %v661_v44, %v662_v50  ;;  %v2426_v34 = vcombine.low %v795_v23, %v799_v24  ;;  %v2435_v39 = vcombine.high %v803_v31, %v807_v32  ;;  %v814_v44 = vld [vmem:[#allocation6 + $0x1f0] sm:$0xff]  ;;  %v811_v47 = vld [vmem:[#allocation6 + $0x1d8] sm:$0xff] }
 0x146   : > { %v815_v48 = vld [vmem:[#allocation6 + $0x1f8] sm:$0xff]  ;;  %v2432_v50 = vcombine.low %v802_v29, %v806_v30 }
 0x147   : > { %v715_v53 = vrot.slane %v708_v51, %v671_v12  ;;  %v735_v54 = vrot.slane %v728_v52, %v671_v12  ;;  %v2434_v51 = vcombine.low %v803_v31, %v807_v32  ;;  %v2441_v52 = vcombine.high %v810_v43, %v814_v44  ;;  %v827_v1 = vld [vmem:[#allocation6 + $0x258] sm:$0xff] }
 0x148   : > { %v2442_v59 = vcombine.low %v811_v47, %v815_v48 }
 0x149   : > { %v722_v55 = vrot.slane %v715_v53, %v671_v12  ;;  %v742_v56 = vrot.slane %v735_v54, %v671_v12  ;;  %v782_v12 = vld [vmem:[#allocation6 + $0xf0] sm:$0xff]  ;;  %v2443_v53 = vcombine.high %v811_v47, %v815_v48 }
 0x14a   : > { %v2409_v38 = vcombine.high %v778_v11, %v782_v12  ;;  %v2408_v17 = vcombine.low %v778_v11, %v782_v12  ;;  %v818_v54 = vld [vmem:[#allocation6 + $0x210] sm:$0xff] }
 0x14b   : > { %725 = vst.msk [vmem:[#allocation2 + $0x2] ss:$4 sm:$0x3] %vm3059_vm1, %v722_v55  ;;  %745 = vst.msk [vmem:[#allocation2 + $0x3] ss:$4 sm:$0x3] %vm3059_vm1, %v742_v56 }
 0x14c   : > { %v822_v55 = vld [vmem:[#allocation6 + $0x230] sm:$0xff]  ;;  %v819_v56 = vld [vmem:[#allocation6 + $0x218] sm:$0xff] }
 0x14d   : > { %v2449_v60 = vcombine.high %v818_v54, %v822_v55 }
 0x152   : > { %v746_v57 = vld [vmem:[#allocation2] sm:$0xff] }
 0x153   : > { %v748_v58 = vcombine.high %v746_v57, %v746_v57  ;;  %v3071_v0 = vpack.c.bf16 %v746_v57, %v746_v57  ;;  %v823_v57 = vld [vmem:[#allocation6 + $0x238] sm:$0xff] }
 0x154   : > { %v2451_v61 = vcombine.high %v819_v56, %v823_v57  ;;  %v2450_v4 = vcombine.low %v819_v56, %v823_v57 }
 0x155   : > { %v751_v63 = vpack.c.bf16 %v748_v58, %v748_v58  ;;  %v2440_v58 = vcombine.low %v810_v43, %v814_v44 }
 0x157   : > { %1552 = vmatprep.mubr.bf16.mxu0 %v751_v63  ;;  %1593 = vmatprep.mubr.bf16.mxu1 %v751_v63 }
 0x158   : > { %1553 = vmatmul.mubr.bf16.vlgmr.msra.gmra.mrb[8].mxu0 %v3071_v0  ;;  %1594 = vmatmul.mubr.bf16.vlgmr.msra.gmra.mrb[8].mxu1 %v3071_v0 }
 0x159   : > { %1603 = vmatpush1.bf16.msra.mxu0 %v2384_v41  ;;  %1644 = vmatpush1.bf16.msra.mxu1 %v2386_v42  ;;  %v786_v41 = vld [vmem:[#allocation6 + $0x110] sm:$0xff] }
 0x15a   : > { %1634 = vmatprep.mubr.bf16.mxu0 %v751_v63  ;;  %1675 = vmatprep.mubr.bf16.mxu1 %v751_v63  ;;  %v790_v42 = vld [vmem:[#allocation6 + $0x130] sm:$0xff] }
 0x15b   : > { %1604 = vmatprep.subr.bf16.mxu0 %v2393_v2  ;;  %1645 = vmatprep.subr.bf16.mxu1 %v2395_v3  ;;  %v2417_v19 = vcombine.high %v786_v41, %v790_v42  ;;  %v2416_v25 = vcombine.low %v786_v41, %v790_v42  ;;  %v830_v63 = vld [vmem:[#allocation6 + $0x270] sm:$0xff]  ;;  %v831_v2 = vld [vmem:[#allocation6 + $0x278] sm:$0xff]  ;;  %v2448_v3 = vcombine.low %v818_v54, %v822_v55 }
 0x15c   : > { %v2457_v5 = vcombine.high %v826_v62, %v830_v63  ;;  %v2459_v6 = vcombine.high %v827_v1, %v831_v2  ;;  %v2456_v11 = vcombine.low %v826_v62, %v830_v63  ;;  %v2458_v12 = vcombine.low %v827_v1, %v831_v2  ;;  %v2641_v62 = vld [vmem:[#allocation8 + $0x8] ss:$16 sps:$4 sm:$0xff]   ;;  %v2643_v63 = vld [vmem:[#allocation8 + $0xc] ss:$16 sps:$4 sm:$0xff]   ;;  %v2646_v1 = vld [vmem:[#allocation8 + $0x24] ss:$16 sps:$4 sm:$0xff]  }
 0x15d   : > { %1605 = vmatpush1.bf16.msra.mxu0 %v2392_v7  ;;  %1646 = vmatpush1.bf16.msra.mxu1 %v2394_v8  ;;  %v834_v7 = vld [vmem:[#allocation6 + $0x290] sm:$0xff]  ;;  %v2649_v2 = vld [vmem:[#allocation8 + $0x2c] ss:$16 sps:$4 sm:$0xff]  }
 0x15e   : > { %1606 = vmatprep.subr.bf16.mxu0 %v2401_v9  ;;  %1647 = vmatprep.subr.bf16.mxu1 %v2403_v10  ;;  %v838_v8 = vld [vmem:[#allocation6 + $0x2b0] sm:$0xff]  ;;  %v835_v9 = vld [vmem:[#allocation6 + $0x298] sm:$0xff] }
 0x15f   : > { %v839_v10 = vld [vmem:[#allocation6 + $0x2b8] sm:$0xff]  ;;  %v2465_v13 = vcombine.high %v834_v7, %v838_v8  ;;  %v2464_v41 = vcombine.low %v834_v7, %v838_v8  ;;  %v2650_v7 = vld [vmem:[#allocation8 + $0x40] ss:$16 sps:$4 sm:$0xff]   ;;  %v2658_v8 = vld [vmem:[#allocation8 + $0x64] ss:$16 sps:$4 sm:$0xff]  }
 0x160   : > { %v2467_v14 = vcombine.high %v835_v9, %v839_v10  ;;  %v2466_v42 = vcombine.low %v835_v9, %v839_v10  ;;  %v2661_v9 = vld [vmem:[#allocation8 + $0x6c] ss:$16 sps:$4 sm:$0xff]   ;;  %v2656_v10 = vld [vmem:[#allocation8 + $0x60] ss:$16 sps:$4 sm:$0xff]  }
 0x161   : > { %1607 = vmatpush1.bf16.msra.mxu0 %v2400_v36  ;;  %1648 = vmatpush1.bf16.msra.mxu1 %v2402_v37  ;;  %v842_v36 = vld [vmem:[#allocation6 + $0x2d0] sm:$0xff] }
 0x162   : > { %1608 = vmatprep.subr.bf16.mxu0 %v2409_v38  ;;  %1649 = vmatprep.subr.bf16.mxu1 %v2411_v40  ;;  %v846_v37 = vld [vmem:[#allocation6 + $0x2f0] sm:$0xff]  ;;  %v843_v38 = vld [vmem:[#allocation6 + $0x2d8] sm:$0xff] }
 0x163   : > { %v847_v40 = vld [vmem:[#allocation6 + $0x2f8] sm:$0xff]  ;;  %v2473_v15 = vcombine.high %v842_v36, %v846_v37  ;;  %v2472_v21 = vcombine.low %v842_v36, %v846_v37  ;;  %v2670_v37 = vld [vmem:[#allocation8 + $0xa4] ss:$16 sps:$4 sm:$0xff]  }
 0x164   : > { %v2475_v16 = vcombine.high %v843_v38, %v847_v40  ;;  %v2474_v22 = vcombine.low %v843_v38, %v847_v40  ;;  %v2665_v36 = vld [vmem:[#allocation8 + $0x88] ss:$16 sps:$4 sm:$0xff]   ;;  %v2673_v38 = vld [vmem:[#allocation8 + $0xac] ss:$16 sps:$4 sm:$0xff]   ;;  %v2668_v40 = vld [vmem:[#allocation8 + $0xa0] ss:$16 sps:$4 sm:$0xff]  }
 0x165   : > { %1609 = vmatpush1.bf16.msra.mxu0 %v2408_v17  ;;  %1650 = vmatpush1.bf16.msra.mxu1 %v2410_v18  ;;  %v850_v17 = vld [vmem:[#allocation6 + $0x310] sm:$0xff] }
 0x166   : > { %1610 = vmatprep.subr.bf16.mxu0 %v2417_v19  ;;  %1651 = vmatprep.subr.bf16.mxu1 %v2419_v20  ;;  %v854_v18 = vld [vmem:[#allocation6 + $0x330] sm:$0xff]  ;;  %v851_v19 = vld [vmem:[#allocation6 + $0x318] sm:$0xff] }
 0x167   : > { %v855_v20 = vld [vmem:[#allocation6 + $0x338] sm:$0xff]  ;;  %v2481_v23 = vcombine.high %v850_v17, %v854_v18  ;;  %v2480_v29 = vcombine.low %v850_v17, %v854_v18  ;;  %v2682_v18 = vld [vmem:[#allocation8 + $0xe4] ss:$16 sps:$4 sm:$0xff]  }
 0x168   : > { %v2483_v24 = vcombine.high %v851_v19, %v855_v20  ;;  %v2482_v30 = vcombine.low %v851_v19, %v855_v20  ;;  %v2677_v17 = vld [vmem:[#allocation8 + $0xc8] ss:$16 sps:$4 sm:$0xff]   ;;  %v2685_v19 = vld [vmem:[#allocation8 + $0xec] ss:$16 sps:$4 sm:$0xff]   ;;  %v2680_v20 = vld [vmem:[#allocation8 + $0xe0] ss:$16 sps:$4 sm:$0xff]  }
 0x169   : > { %1611 = vmatpush1.bf16.msra.mxu0 %v2416_v25  ;;  %1652 = vmatpush1.bf16.msra.mxu1 %v2418_v26  ;;  %v858_v25 = vld [vmem:[#allocation6 + $0x350] sm:$0xff] }
 0x16a   : > { %1612 = vmatprep.subr.bf16.mxu0 %v2425_v27  ;;  %1653 = vmatprep.subr.bf16.mxu1 %v2427_v28  ;;  %v862_v26 = vld [vmem:[#allocation6 + $0x370] sm:$0xff]  ;;  %v859_v27 = vld [vmem:[#allocation6 + $0x358] sm:$0xff] }
 0x16b   : > { %v863_v28 = vld [vmem:[#allocation6 + $0x378] sm:$0xff]  ;;  %v2489_v31 = vcombine.high %v858_v25, %v862_v26  ;;  %v2488_v43 = vcombine.low %v858_v25, %v862_v26  ;;  %v2694_v26 = vld [vmem:[#allocation8 + $0x124] ss:$16 sps:$4 sm:$0xff]  }
 0x16c   : > { %v2491_v32 = vcombine.high %v859_v27, %v863_v28  ;;  %v2490_v44 = vcombine.low %v859_v27, %v863_v28  ;;  %v2689_v25 = vld [vmem:[#allocation8 + $0x108] ss:$16 sps:$4 sm:$0xff]   ;;  %v2697_v27 = vld [vmem:[#allocation8 + $0x12c] ss:$16 sps:$4 sm:$0xff]   ;;  %v2692_v28 = vld [vmem:[#allocation8 + $0x120] ss:$16 sps:$4 sm:$0xff]  }
 0x16d   : > { %1613 = vmatpush1.bf16.msra.mxu0 %v2424_v33  ;;  %1654 = vmatpush1.bf16.msra.mxu1 %v2426_v34  ;;  %v866_v33 = vld [vmem:[#allocation6 + $0x390] sm:$0xff] }
 0x16e   : > { %1614 = vmatprep.subr.bf16.mxu0 %v2433_v35  ;;  %1655 = vmatprep.subr.bf16.mxu1 %v2435_v39  ;;  %v870_v34 = vld [vmem:[#allocation6 + $0x3b0] sm:$0xff]  ;;  %v867_v35 = vld [vmem:[#allocation6 + $0x398] sm:$0xff] }
 0x16f   : > { %v871_v39 = vld [vmem:[#allocation6 + $0x3b8] sm:$0xff]  ;;  %v2497_v47 = vcombine.high %v866_v33, %v870_v34  ;;  %v2496_v54 = vcombine.low %v866_v33, %v870_v34  ;;  %v2706_v34 = vld [vmem:[#allocation8 + $0x164] ss:$16 sps:$4 sm:$0xff]  }
 0x170   : > { %v2499_v48 = vcombine.high %v867_v35, %v871_v39  ;;  %v2498_v55 = vcombine.low %v867_v35, %v871_v39  ;;  %v2701_v33 = vld [vmem:[#allocation8 + $0x148] ss:$16 sps:$4 sm:$0xff]   ;;  %v2709_v35 = vld [vmem:[#allocation8 + $0x16c] ss:$16 sps:$4 sm:$0xff]   ;;  %v2704_v39 = vld [vmem:[#allocation8 + $0x160] ss:$16 sps:$4 sm:$0xff]  }
 0x171   : > { %1615 = vmatpush1.bf16.msra.mxu0 %v2432_v50  ;;  %1656 = vmatpush1.bf16.msra.mxu1 %v2434_v51  ;;  %v874_v50 = vld [vmem:[#allocation6 + $0x3d0] sm:$0xff] }
 0x172   : > { %1616 = vmatprep.subr.bf16.mxu0 %v2441_v52  ;;  %1657 = vmatprep.subr.bf16.mxu1 %v2443_v53  ;;  %v878_v51 = vld [vmem:[#allocation6 + $0x3f0] sm:$0xff]  ;;  %v875_v52 = vld [vmem:[#allocation6 + $0x3d8] sm:$0xff] }
 0x173   : > { %v879_v53 = vld [vmem:[#allocation6 + $0x3f8] sm:$0xff]  ;;  %v2505_v56 = vcombine.high %v874_v50, %v878_v51 }
 0x174   : > { %v2507_v57 = vcombine.high %v875_v52, %v879_v53 }
 0x175   : > { %1617 = vmatpush1.bf16.msra.mxu0 %v2440_v58  ;;  %1658 = vmatpush1.bf16.msra.mxu1 %v2442_v59  ;;  %v2504_v58 = vcombine.low %v874_v50, %v878_v51  ;;  %v2506_v59 = vcombine.low %v875_v52, %v879_v53  ;;  %v2713_v50 = vld [vmem:[#allocation8 + $0x188] ss:$16 sps:$4 sm:$0xff]   ;;  %v2718_v51 = vld [vmem:[#allocation8 + $0x1a4] ss:$16 sps:$4 sm:$0xff]   ;;  %v2721_v52 = vld [vmem:[#allocation8 + $0x1ac] ss:$16 sps:$4 sm:$0xff]  }
 0x176   : > { %1618 = vmatprep.subr.bf16.mxu0 %v2449_v60  ;;  %1659 = vmatprep.subr.bf16.mxu1 %v2451_v61  ;;  %v2638_v60 = vld [vmem:[#allocation8] ss:$16 sps:$4 sm:$0xff]   ;;  %v2640_v61 = vld [vmem:[#allocation8 + $0x4] ss:$16 sps:$4 sm:$0xff]  }
 0x177   : > { %v2716_v53 = vld [vmem:[#allocation8 + $0x1a0] ss:$16 sps:$4 sm:$0xff]  }
 0x179   : > { %1619 = vmatpush1.bf16.msra.mxu0 %v2448_v3  ;;  %1660 = vmatpush1.bf16.msra.mxu1 %v2450_v4  ;;  %v2644_v3 = vld [vmem:[#allocation8 + $0x20] ss:$16 sps:$4 sm:$0xff]   ;;  %v2647_v4 = vld [vmem:[#allocation8 + $0x28] ss:$16 sps:$4 sm:$0xff]  }
 0x17a   : > { %1620 = vmatprep.subr.bf16.mxu0 %v2457_v5  ;;  %1661 = vmatprep.subr.bf16.mxu1 %v2459_v6  ;;  %v2652_v5 = vld [vmem:[#allocation8 + $0x44] ss:$16 sps:$4 sm:$0xff]   ;;  %v2655_v6 = vld [vmem:[#allocation8 + $0x4c] ss:$16 sps:$4 sm:$0xff]  }
 0x17d   : > { %1621 = vmatpush1.bf16.msra.mxu0 %v2456_v11  ;;  %1662 = vmatpush1.bf16.msra.mxu1 %v2458_v12  ;;  %v2659_v11 = vld [vmem:[#allocation8 + $0x68] ss:$16 sps:$4 sm:$0xff]   ;;  %v2664_v12 = vld [vmem:[#allocation8 + $0x84] ss:$16 sps:$4 sm:$0xff]  }
 0x17e   : > { %1622 = vmatprep.subr.bf16.mxu0 %v2465_v13  ;;  %1663 = vmatprep.subr.bf16.mxu1 %v2467_v14  ;;  %v2667_v13 = vld [vmem:[#allocation8 + $0x8c] ss:$16 sps:$4 sm:$0xff]   ;;  %v2662_v14 = vld [vmem:[#allocation8 + $0x80] ss:$16 sps:$4 sm:$0xff]  }
 0x181   : > { %1623 = vmatpush1.bf16.msra.mxu0 %v2464_v41  ;;  %1664 = vmatpush1.bf16.msra.mxu1 %v2466_v42  ;;  %v2671_v41 = vld [vmem:[#allocation8 + $0xa8] ss:$16 sps:$4 sm:$0xff]   ;;  %v2676_v42 = vld [vmem:[#allocation8 + $0xc4] ss:$16 sps:$4 sm:$0xff]  }
 0x182   : > { %1624 = vmatprep.subr.bf16.mxu0 %v2473_v15  ;;  %1665 = vmatprep.subr.bf16.mxu1 %v2475_v16  ;;  %v2679_v15 = vld [vmem:[#allocation8 + $0xcc] ss:$16 sps:$4 sm:$0xff]   ;;  %v2674_v16 = vld [vmem:[#allocation8 + $0xc0] ss:$16 sps:$4 sm:$0xff]  }
 0x185   : > { %1625 = vmatpush1.bf16.msra.mxu0 %v2472_v21  ;;  %1666 = vmatpush1.bf16.msra.mxu1 %v2474_v22  ;;  %v2683_v21 = vld [vmem:[#allocation8 + $0xe8] ss:$16 sps:$4 sm:$0xff]   ;;  %v2688_v22 = vld [vmem:[#allocation8 + $0x104] ss:$16 sps:$4 sm:$0xff]  }
 0x186   : > { %1626 = vmatprep.subr.bf16.mxu0 %v2481_v23  ;;  %1667 = vmatprep.subr.bf16.mxu1 %v2483_v24  ;;  %v2691_v23 = vld [vmem:[#allocation8 + $0x10c] ss:$16 sps:$4 sm:$0xff]   ;;  %v2686_v24 = vld [vmem:[#allocation8 + $0x100] ss:$16 sps:$4 sm:$0xff]  }
 0x189   : > { %1627 = vmatpush1.bf16.msra.mxu0 %v2480_v29  ;;  %1668 = vmatpush1.bf16.msra.mxu1 %v2482_v30  ;;  %v2695_v29 = vld [vmem:[#allocation8 + $0x128] ss:$16 sps:$4 sm:$0xff]   ;;  %v2700_v30 = vld [vmem:[#allocation8 + $0x144] ss:$16 sps:$4 sm:$0xff]  }
 0x18a   : > { %1628 = vmatprep.subr.bf16.mxu0 %v2489_v31  ;;  %1669 = vmatprep.subr.bf16.mxu1 %v2491_v32  ;;  %v2703_v31 = vld [vmem:[#allocation8 + $0x14c] ss:$16 sps:$4 sm:$0xff]   ;;  %v2698_v32 = vld [vmem:[#allocation8 + $0x140] ss:$16 sps:$4 sm:$0xff]  }
 0x18d   : > { %1629 = vmatpush1.bf16.msra.mxu0 %v2488_v43  ;;  %1670 = vmatpush1.bf16.msra.mxu1 %v2490_v44  ;;  %v2707_v43 = vld [vmem:[#allocation8 + $0x168] ss:$16 sps:$4 sm:$0xff]   ;;  %v2712_v44 = vld [vmem:[#allocation8 + $0x184] ss:$16 sps:$4 sm:$0xff]  }
 0x18e   : > { %1630 = vmatprep.subr.bf16.mxu0 %v2497_v47  ;;  %1671 = vmatprep.subr.bf16.mxu1 %v2499_v48  ;;  %v2715_v47 = vld [vmem:[#allocation8 + $0x18c] ss:$16 sps:$4 sm:$0xff]   ;;  %v2710_v48 = vld [vmem:[#allocation8 + $0x180] ss:$16 sps:$4 sm:$0xff]  }
 0x191   : > { %1631 = vmatpush1.bf16.msra.mxu0 %v2496_v54  ;;  %1672 = vmatpush1.bf16.msra.mxu1 %v2498_v55  ;;  %v2719_v54 = vld [vmem:[#allocation8 + $0x1a8] ss:$16 sps:$4 sm:$0xff]   ;;  %v2724_v55 = vld [vmem:[#allocation8 + $0x1c4] ss:$16 sps:$4 sm:$0xff]  }
 0x192   : > { %1632 = vmatprep.subr.bf16.mxu0 %v2505_v56  ;;  %1673 = vmatprep.subr.bf16.mxu1 %v2507_v57  ;;  %v2727_v56 = vld [vmem:[#allocation8 + $0x1cc] ss:$16 sps:$4 sm:$0xff]   ;;  %v2722_v57 = vld [vmem:[#allocation8 + $0x1c0] ss:$16 sps:$4 sm:$0xff]  }
 0x195   : > { %1633 = vmatpush1.bf16.msra.mxu0 %v2504_v58  ;;  %1674 = vmatpush1.bf16.msra.mxu1 %v2506_v59  ;;  %v2725_v58 = vld [vmem:[#allocation8 + $0x1c8] ss:$16 sps:$4 sm:$0xff]   ;;  %v2730_v59 = vld [vmem:[#allocation8 + $0x1e4] ss:$16 sps:$4 sm:$0xff]  }
 0x196   : > { %2117 = vmatprep.subr.bf16.mxu0 %v2640_v61  ;;  %2158 = vmatprep.subr.bf16.mxu1 %v2643_v63  ;;  %v2728_v61 = vld [vmem:[#allocation8 + $0x1e0] ss:$16 sps:$4 sm:$0xff]  }
 0x198   : > { %1635 = vmatmul.mubr.bf16.vlgmr.msra.gmra.mrb[12].mxu0 %v3071_v0  ;;  %1676 = vmatmul.mubr.bf16.vlgmr.msra.gmra.mrb[12].mxu1 %v3071_v0  ;;  %v2653_v0 = vld [vmem:[#allocation8 + $0x48] ss:$16 sps:$4 sm:$0xff]  }
 0x199   : > { %2118 = vmatpush1.bf16.msra.mxu0 %v2638_v60  ;;  %2159 = vmatpush1.bf16.msra.mxu1 %v2641_v62  ;;  %v2733_v60 = vld [vmem:[#allocation8 + $0x1ec] ss:$16 sps:$4 sm:$0xff]   ;;  %v2731_v62 = vld [vmem:[#allocation8 + $0x1e8] ss:$16 sps:$4 sm:$0xff]  }
 0x19a   : > { %2119 = vmatprep.subr.bf16.mxu0 %v2646_v1  ;;  %2160 = vmatprep.subr.bf16.mxu1 %v2649_v2 }
 0x19d   : > { %2120 = vmatpush1.bf16.msra.mxu0 %v2644_v3  ;;  %2161 = vmatpush1.bf16.msra.mxu1 %v2647_v4 }
 0x19e   : > { %2121 = vmatprep.subr.bf16.mxu0 %v2652_v5  ;;  %2162 = vmatprep.subr.bf16.mxu1 %v2655_v6 }
 0x1a1   : > { %2122 = vmatpush1.bf16.msra.mxu0 %v2650_v7  ;;  %2163 = vmatpush1.bf16.msra.mxu1 %v2653_v0 }
 0x1a2   : > { %2123 = vmatprep.subr.bf16.mxu0 %v2658_v8  ;;  %2164 = vmatprep.subr.bf16.mxu1 %v2661_v9  ;;  %v1715_v9 = vld [vmem:[%s3107_s4] sm:$0x3] }
 0x1a5   : > { %2124 = vmatpush1.bf16.msra.mxu0 %v2656_v10  ;;  %2165 = vmatpush1.bf16.msra.mxu1 %v2659_v11 }
 0x1a6   : > { %2125 = vmatprep.subr.bf16.mxu0 %v2664_v12  ;;  %2166 = vmatprep.subr.bf16.mxu1 %v2667_v13 }
 0x1a9   : > { %2126 = vmatpush1.bf16.msra.mxu0 %v2662_v14  ;;  %2167 = vmatpush1.bf16.msra.mxu1 %v2665_v36 }
 0x1aa   : > { %2127 = vmatprep.subr.bf16.mxu0 %v2670_v37  ;;  %2168 = vmatprep.subr.bf16.mxu1 %v2673_v38 }
 0x1ad   : > { %2128 = vmatpush1.bf16.msra.mxu0 %v2668_v40  ;;  %2169 = vmatpush1.bf16.msra.mxu1 %v2671_v41 }
 0x1ae   : > { %2129 = vmatprep.subr.bf16.mxu0 %v2676_v42  ;;  %2170 = vmatprep.subr.bf16.mxu1 %v2679_v15 }
 0x1b1   : > { %2130 = vmatpush1.bf16.msra.mxu0 %v2674_v16  ;;  %2171 = vmatpush1.bf16.msra.mxu1 %v2677_v17  ;;  %v1720_v16 = vrot.slane %v1715_v9, %v449_v46 }
 0x1b2   : > { %2131 = vmatprep.subr.bf16.mxu0 %v2682_v18  ;;  %2172 = vmatprep.subr.bf16.mxu1 %v2685_v19 }
 0x1b5   : > { %2132 = vmatpush1.bf16.msra.mxu0 %v2680_v20  ;;  %2173 = vmatpush1.bf16.msra.mxu1 %v2683_v21  ;;  %v1724_v21 = vrot.slane %v1715_v9, %v453_v49 }
 0x1b6   : > { %2133 = vmatprep.subr.bf16.mxu0 %v2688_v22  ;;  %2174 = vmatprep.subr.bf16.mxu1 %v2691_v23 }
 0x1b9   : > { %2134 = vmatpush1.bf16.msra.mxu0 %v2686_v24  ;;  %2175 = vmatpush1.bf16.msra.mxu1 %v2689_v25 }
 0x1ba   : > { %2135 = vmatprep.subr.bf16.mxu0 %v2694_v26  ;;  %2176 = vmatprep.subr.bf16.mxu1 %v2697_v27 }
 0x1bd   : > { %2136 = vmatpush1.bf16.msra.mxu0 %v2692_v28  ;;  %2177 = vmatpush1.bf16.msra.mxu1 %v2695_v29 }
 0x1be   : > { %2137 = vmatprep.subr.bf16.mxu0 %v2700_v30  ;;  %2178 = vmatprep.subr.bf16.mxu1 %v2703_v31 }
 0x1c1   : > { %2138 = vmatpush1.bf16.msra.mxu0 %v2698_v32  ;;  %2179 = vmatpush1.bf16.msra.mxu1 %v2701_v33  ;;  %v2844_v33 = vmov 0.0  }
 0x1c2   : > { %2139 = vmatprep.subr.bf16.mxu0 %v2706_v34  ;;  %2180 = vmatprep.subr.bf16.mxu1 %v2709_v35 }
 0x1c5   : > { %2140 = vmatpush1.bf16.msra.mxu0 %v2704_v39  ;;  %2181 = vmatpush1.bf16.msra.mxu1 %v2707_v43 }
 0x1c6   : > { %2141 = vmatprep.subr.bf16.mxu0 %v2712_v44  ;;  %2182 = vmatprep.subr.bf16.mxu1 %v2715_v47 }
 0x1c9   : > { %2142 = vmatpush1.bf16.msra.mxu0 %v2710_v48  ;;  %2183 = vmatpush1.bf16.msra.mxu1 %v2713_v50 }
 0x1ca   : > { %2143 = vmatprep.subr.bf16.mxu0 %v2718_v51  ;;  %2184 = vmatprep.subr.bf16.mxu1 %v2721_v52  ;;  %v2734_v52 = vld [vmem:[%s3109_s6] sm:$0xff]  }
 0x1cd   : > { %2144 = vmatpush1.bf16.msra.mxu0 %v2716_v53  ;;  %2185 = vmatpush1.bf16.msra.mxu1 %v2719_v54  ;;  %v2211_v53 = vpop.permute.xlu0 %2210 }
 0x1ce   : > { %2145 = vmatprep.subr.bf16.mxu0 %v2724_v55  ;;  %2186 = vmatprep.subr.bf16.mxu1 %v2727_v56 }
 0x1d1   : > { %2146 = vmatpush1.bf16.msra.mxu0 %v2722_v57  ;;  %2187 = vmatpush1.bf16.msra.mxu1 %v2725_v58 }
 0x1d2   : > { %2147 = vmatprep.subr.bf16.mxu0 %v2730_v59  ;;  %2188 = vmatprep.subr.bf16.mxu1 %v2733_v60 }
 0x1d5   : > { %2148 = vmatpush1.bf16.msra.mxu0 %v2728_v61  ;;  %2189 = vmatpush1.bf16.msra.mxu1 %v2731_v62 }
 0x1d6   : > { %2581 = vmatprep.subr.bf16.mxu0 %v2844_v33 }
 0x22b   : > { %v1554_v63 = vpop.f32.mrb[8].mxu0  ;;  %v1595_v1 = vpop.f32.mrb[8].mxu1 }
 0x22c   : > { %v1556_v2 = vpop.f32.mrb[9].mxu0  ;;  %v1597_v3 = vpop.f32.mrb[9].mxu1  ;;  %v1697_v0 = vrot.slane %v1554_v63, 1 }
 0x22d   : > { %v1558_v4 = vpop.f32.mrb[10].mxu0  ;;  %v1599_v5 = vpop.f32.mrb[10].mxu1  ;;  %v1698_v8 = vrot.slane %v1556_v2, 1 }
 0x22e   : > { %v1559_v6 = vpop.f32.mrb[11].mxu0  ;;  %v1600_v7 = vpop.f32.mrb[11].mxu1  ;;  %v1702_v11 = vsel %vm1701_vm2, %v1697_v0, 0.0 }
 0x22f   : > { %v1703_v37 = vsel %vm1701_vm2, %v1698_v8, 0.0 }
 0x26b   : > { %v1636_v10 = vpop.f32.mrb[12].mxu0  ;;  %v1677_v12 = vpop.f32.mrb[12].mxu1 }
 0x26c   : > { %v1704_v13 = vadd.f32 %v1702_v11, %v1636_v10  ;;  %v1686_v14 = vrot.slane %v1677_v12, 7  ;;  %v1638_v36 = vpop.f32.mrb[13].mxu0  ;;  %v1679_v38 = vpop.f32.mrb[13].mxu1 }
 0x26d   : > { %v1705_v40 = vadd.f32 %v1703_v37, %v1638_v36  ;;  %v1687_v41 = vrot.slane %v1679_v38, 7  ;;  %v1640_v42 = vpop.f32.mrb[14].mxu0  ;;  %v1681_v15 = vpop.f32.mrb[14].mxu1 }
 0x26e   : > { %v1708_v17 = vrot.slane %v1704_v13, 4  ;;  %v1691_v18 = vsel %vm1690_vm3, 0.0, %v1686_v14  ;;  %v1641_v19 = vpop.f32.mrb[15].mxu0  ;;  %v1682_v20 = vpop.f32.mrb[15].mxu1 }
 0x26f   : > { %v1693_v22 = vadd.f32 %v1691_v18, %v1595_v1  ;;  %v1709_v23 = vrot.slane %v1705_v40, 4  ;;  %v1692_v24 = vsel %vm1690_vm3, 0.0, %v1687_v41 }
 0x270   : > { %v1694_v25 = vadd.f32 %v1692_v24, %v1597_v3 }
 0x271   : > { %v1713_v26 = vsel %vm1712_vm4, %v1693_v22, %v1708_v17 }
 0x272   : > { %v1714_v27 = vsel %vm1712_vm4, %v1694_v25, %v1709_v23  ;;  %v1727_v28 = vadd.f32 %v1720_v16, %v1713_v26 }
 0x273   : > { %v1728_v29 = vadd.f32 %v1724_v21, %v1714_v27 }
 0x274   : > { %v1729_v30 = vmax.f32 %v1727_v28, 0.0 }
 0x275   : > { %v1730_v46 = vmax.f32 %v1728_v29, 0.0 }
 0x276   : > { %v1731_v32 = vpack.c.bf16 %v1729_v30, %v1729_v30 }
 0x277   : > { %v1732_v31 = vpack.c.bf16 %v1730_v46, %v1730_v46 }
 0x279   : > { %2149 = vmatprep.mubr.bf16.mxu0 %v1732_v31  ;;  %2190 = vmatprep.mubr.bf16.mxu1 %v1732_v31 }
 0x27a   : > { %2150 = vmatmul.mubr.bf16.vlgmr.msra.gmra.mrb[16].mxu0 %v1731_v32  ;;  %2191 = vmatmul.mubr.bf16.vlgmr.msra.gmra.mrb[16].mxu1 %v1731_v32 }
 0x27b   : > { %2585 = vmatprep.mubr.msk.bf16.mxu0 %vm2845_vm5, %v2844_v33 }
 0x34d   : > { %v2151_v49 = vpop.f32.mrb[16].mxu0  ;;  %v2192_v34 = vpop.f32.mrb[16].mxu1 }
 0x34e   : > { %v2153_v35 = vpop.f32.mrb[17].mxu0  ;;  %v2194_v39 = vpop.f32.mrb[17].mxu1 }
 0x34f   : > { %v2201_v43 = vpack.c.bf16 %v2153_v35, %v2151_v49  ;;  %v2202_v44 = vpack.c.bf16 %v2194_v39, %v2192_v34  ;;  %v2155_v47 = vpop.f32.mrb[18].mxu0  ;;  %v2196_v48 = vpop.f32.mrb[18].mxu1 }
 0x350   : > { %v2156_v50 = vpop.f32.mrb[19].mxu0  ;;  %v2197_v51 = vpop.f32.mrb[19].mxu1 }
 0x351   : > { %2582 = vmatpush3.bf16.msra.mxu0 %v2201_v43 }
 0x352   : > { %2583 = vmatprep.subr.bf16.mxu0 %v2844_v33 }
 0x355   : > { %2584 = vmatpush3.bf16.msra.mxu0 %v2202_v44 }
 0x358   : > { %2586 = vmatmul.mubr.msk.bf16.vlgmr.msra.gmra.mrb[20].mxu0 %vm487_vm0, %v2734_v52 }
 0x42b   : > { %v2255_v54 = vpop.f32.mrb[20].mxu0 }
 0x42c   : > { %v2256_v55 = vadd.f32 %v2255_v54, %v2211_v53  ;;  %v2587_v56 = vpop.f32.mrb[21].mxu0 }
 0x42d   : > { %v2258_v57 = vpop.f32.mrb[22].mxu0 }
 0x42e   : > { %2262 = vst [vmem:[%s345_s28] sm:$0xff] %v2256_v55  ;;  %v2259_v58 = vadd.f32 %v2258_v57, %v2211_v53  ;;  %v2588_v59 = vpop.f32.mrb[23].mxu0 }
 0x430   : > { %2263 = vst [vmem:[%s345_s28 + $0x8] sm:$0xff] %v2259_v58 }
 0x431 PF: > { %s22_s29 = sadd.s32 1, %s2833_s29  }
 0x432   : > { %p19_p2 = scmp.ge.s32.totalorder %s22_s29, 4  }
 0x434   :  { %21 = sbr.rel (!%p19_p2) target bundleno = 5 (0x5), region = 98 }
 0x43b   :  { %2285 = vsyncpa [#allocation5], 1 }
 0x43c   :  { %2287 = vsyncpa [#allocation5 + $0x1], 1 }
 0x43d   :  { %2288 = vsyncpa [#allocation7], 1 }

</bundles_post_ra>
